<compile_context>
chip_gen: v5e
topology: v5e:2x2
jax: 0.10.0
libtpu: 0.0.40
codegen_flags: <defaults>
</compile_context>

<pallas_src>
import functools

import jax
import jax.numpy as jnp
from jax.experimental import pallas as pl
from jax.experimental.pallas import tpu as pltpu


_MAX_M_TILE = 1024                     # pixels (lanes) per grid step
_VMEM_LIMIT_BYTES = 32 * 1024 * 1024   # > v5e 16 MiB scoped default, < v7x 64 MiB physical


def _pick_m_tile(m, max_tile=_MAX_M_TILE):
    """Lane-dense M tile: multiple of 128 dividing m, preferring >=2 grid steps
    (v7x megacore).  Small / non-128-multiple pixel counts fall back to one
    full-extent block (valid via the full-dim exception)."""
    if m % 128 != 0:
        # TODO(synk): very large non-128-multiple pixel counts would need an
        # in-kernel masked ragged tail instead of a single full block.
        return m
    for t in (max_tile, 512, 256, 128):
        if m % t == 0 and m // t >= 2:
            return t
    return 128


def _compiler_params():
    return pltpu.CompilerParams(
        dimension_semantics=("parallel",),
        vmem_limit_bytes=_VMEM_LIMIT_BYTES)


def _erf(x):
    """Abramowitz & Stegun 7.1.26 erf (|err| <= 1.5e-7).  Built only from ops Mosaic
    lowers for sure (abs / exp / where); exp goes to the otherwise-idle EUP slot."""
    p = 0.3275911
    a1, a2, a3, a4, a5 = (0.254829592, -0.284496736, 1.421413741,
                          -1.453152027, 1.061405429)
    ax = jnp.abs(x)
    t = 1.0 / (1.0 + p * ax)
    poly = ((((a5 * t + a4) * t + a3) * t + a2) * t + a1) * t
    y = 1.0 - poly * jnp.exp(-ax * ax)
    return jnp.where(x >= 0.0, y, -y)


def _matmul_1x1(w, x):
    """W(Cout,Cin) @ X(Cin,Mt) with f32 accumulation.  At Cin=4..16 the contraction
    is a tiny fraction of an MXU pass, so an unrolled VPU FMA (column x row
    broadcasts) is used; larger channel counts go to the MXU."""
    _, cin = w.shape
    if cin >= 64:
        return jnp.dot(w, x, preferred_element_type=jnp.float32)
    wf = w.astype(jnp.float32)
    xf = x.astype(jnp.float32)
    acc = wf[:, 0:1] * xf[0:1, :]
    for i in range(1, cin):
        acc = acc + wf[:, i:i + 1] * xf[i:i + 1, :]
    return acc


# ---------------------------------------------------------------------------
# Pallas kernels
# ---------------------------------------------------------------------------
def _pw_conv_kernel(x_ref, w_ref, b_ref, o_ref, *, act):
    """act( W @ X + b ) on a (Cin, Mt) tile — pixels on the lane axis (lane-dense)."""
    acc = _matmul_1x1(w_ref[...], x_ref[...]) + b_ref[...]
    if act == "silu":
        acc = acc * jax.nn.sigmoid(acc)
    elif act == "gelu":                            # exact (erf) GELU = nn.GELU()
        acc = 0.5 * acc * (1.0 + _erf(acc * 0.7071067811865476))
    elif act == "relu":
        acc = jnp.maximum(acc, 0.0)
    # act == "none": linear
    o_ref[...] = acc.astype(o_ref.dtype)


def _ok_epilogue_kernel(x_ref, out0_ref, d13_ref, d31_ref, d33_ref, fgm_ref,
                        xsca_ref, dw11w_ref, rbias_ref, alpha_ref, beta_ref,
                        wout_ref, bout_ref, o_ref):
    """Fused OmniKernel tail on a (C, Mt) tile (all math in f32 registers):
         s   = x + d13 + d31 + d33 + out0*dw11_w + (b13+b31+b33+b11)
         y   = ReLU( s + |fgm| * alpha + x_sca * beta )
         out = W_out @ y + b_out            (1x1 out_conv)
    """
    f32 = jnp.float32
    s = (x_ref[...].astype(f32) + d13_ref[...].astype(f32)
         + d31_ref[...].astype(f32) + d33_ref[...].astype(f32)
         + out0_ref[...].astype(f32) * dw11w_ref[...] + rbias_ref[...])
    y = (s + fgm_ref[...].astype(f32) * alpha_ref[...]
         + xsca_ref[...].astype(f32) * beta_ref[...])
    y = jnp.maximum(y, 0.0)
    acc = _matmul_1x1(wout_ref[...], y) + bout_ref[...]
    o_ref[...] = acc.astype(o_ref.dtype)


# ---------------------------------------------------------------------------
# Pallas wrappers (channels-major (C, M) layout, M = N*H*W on the lane axis)
# ---------------------------------------------------------------------------
def pallas_pointwise_conv(x_cm, w_oi, b_o, act="none", dtype=jnp.float32):
    """1x1 conv + bias + activation.  x_cm: (Cin, M); w_oi: (Cout, Cin); b_o: (Cout,)."""
    Cin, M = x_cm.shape
    Cout = w_oi.shape[0]
    mt = _pick_m_tile(M)
    x_k = x_cm.astype(dtype)                        # stream activations narrow
    w_k = w_oi.astype(jnp.float32)                  # tiny weights stay f32
    b_k = b_o.reshape(Cout, 1).astype(jnp.float32)

    return pl.pallas_call(
        functools.partial(_pw_conv_kernel, act=act),
        out_shape=jax.ShapeDtypeStruct((Cout, M), jnp.float32),
        grid=(M // mt,),
        in_specs=[
            pl.BlockSpec((Cin, mt), lambda i: (0, i)),
            pl.BlockSpec((Cout, Cin), lambda i: (0, 0)),
            pl.BlockSpec((Cout, 1), lambda i: (0, 0)),
        ],
        out_specs=pl.BlockSpec((Cout, mt), lambda i: (0, i)),
        compiler_params=_compiler_params(),
        cost_estimate=pl.CostEstimate(
            flops=2 * M * Cin * Cout,
            transcendentals=M * Cout if act in ("silu", "gelu") else 0,
            bytes_accessed=int(x_k.dtype.itemsize) * M * Cin
                           + 4 * M * Cout + 4 * Cin * Cout),
    )(x_k, w_k, b_k)


def pallas_ok_epilogue(x_res, out0, d13, d31, d33, fgm_abs, x_sca,
                       dw11_w, res_bias, alpha, beta, w_out, b_out,
                       dtype=jnp.float32):
    """Fused residual sum + dw11 affine + FGM affine + ReLU + out_conv (1x1)."""
    C, M = x_res.shape
    Cout = w_out.shape[0]
    mt = _pick_m_tile(M)

    cast = lambda t: t.astype(dtype)
    col = lambda v: v.reshape(C, 1).astype(jnp.float32)
    stream_spec = pl.BlockSpec((C, mt), lambda i: (0, i))
    chan_spec = pl.BlockSpec((C, 1), lambda i: (0, 0))

    return pl.pallas_call(
        _ok_epilogue_kernel,
        out_shape=jax.ShapeDtypeStruct((Cout, M), jnp.float32),
        grid=(M // mt,),
        in_specs=[stream_spec] * 7 + [chan_spec] * 4 + [
            pl.BlockSpec((Cout, C), lambda i: (0, 0)),
            pl.BlockSpec((Cout, 1), lambda i: (0, 0)),
        ],
        out_specs=pl.BlockSpec((Cout, mt), lambda i: (0, i)),
        compiler_params=_compiler_params(),
        cost_estimate=pl.CostEstimate(
            flops=2 * M * C * Cout + 12 * M * C,
            transcendentals=0,
            bytes_accessed=(7 * int(jnp.dtype(dtype).itemsize) + 4) * M * C
                           + 4 * M * Cout),
    )(cast(x_res), cast(out0), cast(d13), cast(d31), cast(d33),
      cast(fgm_abs), cast(x_sca),
      col(dw11_w), col(res_bias), col(alpha), col(beta),
      w_out.astype(jnp.float32), col(b_out))


# ---------------------------------------------------------------------------
# Plain-JAX glue (FFT, pooling, 31-tap depthwise convs)
# ---------------------------------------------------------------------------
def _fold_bn_1x1(p, eps):
    """Fold BatchNorm2d (running stats) into a bias-free 1x1 conv."""
    scale = p["gamma"] / jnp.sqrt(p["var"] + eps)
    w = p["w"][:, :, 0, 0] * scale[:, None]          # (Cout, Cin)
    b = p["beta"] - p["mean"] * scale
    return w, b


def _dw_conv_cnhw(x_cnhw, w_oihw, padding):
    """Depthwise conv in the channels-major (C, N, H, W) layout (bias handled in the
    fused epilogue).  w_oihw: (C, 1, kh, kw)."""
    C = x_cnhw.shape[0]
    return jax.lax.conv_general_dilated(
        x_cnhw, w_oihw, window_strides=(1, 1),
        padding=((padding[0], padding[0]), (padding[1], padding[1])),
        dimension_numbers=("CNHW", "OIHW", "CNHW"),
        feature_group_count=C)


def _pw_small(x_cn, w_oihw, b):
    """1x1 conv on pooled (C, N) features — too tiny to justify a kernel launch."""
    return jnp.dot(w_oihw[:, :, 0, 0], x_cn) + b[:, None]


def omnikernel_forward(ok_cm, p, spatial, dtype=jnp.float32):
    """OmniKernel forward.  ok_cm: (C, N*H*W) channels-major activation."""
    C, M = ok_cm.shape
    N, H, W = spatial

    # in_conv (1x1, Pallas) with exact-erf GELU fused into the kernel epilogue.
    out0 = pallas_pointwise_conv(ok_cm, p["in_w"][:, :, 0, 0], p["in_b"],
                                 act="gelu", dtype=dtype)
    out0_4d = out0.reshape(C, N, H, W)

    # Frequency-domain channel attention.
    # TODO(synk): fft2/ifft2 + complex math have no Pallas TPU primitive; kept in XLA (f32).
    fac_pool = jnp.mean(out0_4d, axis=(2, 3))                       # (C, N)
    x_att = _pw_small(fac_pool, p["fac_w"], p["fac_b"])
    x_fft = jnp.fft.fft2(out0_4d, axes=(2, 3))
    x_fca = jnp.abs(jnp.fft.ifft2(x_att[:, :, None, None] * x_fft, axes=(2, 3)))

    # Spatial-domain channel attention (per-(channel,batch) scale; broadcast mult in XLA).
    pool = jnp.mean(x_fca, axis=(2, 3))                             # (C, N)
    x_att2 = _pw_small(pool, p["conv_w"], p["conv_b"])
    x_sca_4d = x_att2[:, :, None, None] * x_fca
    x_sca = x_sca_4d.reshape(C, M)

    # FGM: dwconv1 + dwconv2 fused into ONE Pallas matmul (weights concatenated on
    # the output-channel axis -> single pass over x_sca, 2C-wide output block).
    w12 = jnp.concatenate([p["fgm_d1_w"][:, :, 0, 0], p["fgm_d2_w"][:, :, 0, 0]], axis=0)
    b12 = jnp.concatenate([p["fgm_d1_b"], p["fgm_d2_b"]], axis=0)
    x12 = pallas_pointwise_conv(x_sca, w12, b12, act="none", dtype=dtype)
    x1_4d = x12[:C].reshape(C, N, H, W)
    x2_4d = x12[C:].reshape(C, N, H, W)
    fgm_abs = jnp.abs(jnp.fft.ifft2(x1_4d * jnp.fft.fft2(x2_4d, axes=(2, 3)),
                                    axes=(2, 3))).reshape(C, M)

    # Large-kernel depthwise branch.
    # TODO(synk): 31-tap depthwise convs stay on XLA's conv — no efficient MXU mapping
    # at 4 channels, and 961 unrolled taps would flood the vld/vst slots.
    d13 = _dw_conv_cnhw(out0_4d, p["dw13_w"], (0, 15)).reshape(C, M)
    d31 = _dw_conv_cnhw(out0_4d, p["dw31_w"], (15, 0)).reshape(C, M)
    d33 = _dw_conv_cnhw(out0_4d, p["dw33_w"], (15, 15)).reshape(C, M)

    # dw_11 (depthwise 1x1 == per-channel affine) and all depthwise biases fold into
    # the fused epilogue; the residual sum is never materialized by XLA.
    res_bias = p["dw13_b"] + p["dw31_b"] + p["dw33_b"] + p["dw11_b"]
    return pallas_ok_epilogue(
        ok_cm, out0, d13, d31, d33, fgm_abs, x_sca,
        p["dw11_w"][:, 0, 0, 0], res_bias,
        p["fgm_alpha"][:, 0, 0], p["fgm_beta"][:, 0, 0],
        p["out_w"][:, :, 0, 0], p["out_b"], dtype=dtype)


def csp_omnikernel_forward(x_nchw, params, e=0.25, eps=1e-5, dtype=jnp.float32):
    N, dim, H, W = x_nchw.shape
    c_ok = int(dim * e)
    M = N * H * W

    # Channels-major (C, N*H*W): pixels land on the 128-lane axis so every Pallas
    # load/store is lane-dense even at C = 4..16; channel split/cat are contiguous.
    x_cm = jnp.transpose(x_nchw, (1, 0, 2, 3)).reshape(dim, M).astype(jnp.float32)

    w1, b1 = _fold_bn_1x1(params["cv1"], eps)
    y = pallas_pointwise_conv(x_cm, w1, b1, act="silu", dtype=dtype)

    ok, identity = y[:c_ok], y[c_ok:]
    m_out = omnikernel_forward(ok, params["m"], (N, H, W), dtype=dtype)

    cat = jnp.concatenate([m_out, identity], axis=0)
    w2, b2 = _fold_bn_1x1(params["cv2"], eps)
    out = pallas_pointwise_conv(cat, w2, b2, act="silu", dtype=dtype)

    return jnp.transpose(out.reshape(dim, N, H, W), (1, 0, 2, 3))   # back to NCHW


# ---------------------------------------------------------------------------
# Pure-JAX reference (NCHW, mirrors the PyTorch module) for the sanity check.
# ---------------------------------------------------------------------------
def _conv2d_nchw(x, w, b=None, padding=(0, 0), groups=1):
    y = jax.lax.conv_general_dilated(
        x, w, (1, 1), ((padding[0], padding[0]), (padding[1], padding[1])),
        dimension_numbers=("NCHW", "OIHW", "NCHW"),
        feature_group_count=groups)
    if b is not None:
        y = y + b[None, :, None, None]
    return y


def _bn_nchw(x, p, eps):
    s = p["gamma"] / jnp.sqrt(p["var"] + eps)
    return (x - p["mean"][None, :, None, None]) * s[None, :, None, None] \
        + p["beta"][None, :, None, None]


def csp_omnikernel_reference(x, params, e=0.25, eps=1e-5):
    dim = x.shape[1]
    c_ok = int(dim * e)

    def conv_bn_silu(t, p):
        z = _bn_nchw(_conv2d_nchw(t, p["w"]), p, eps)
        return z * jax.nn.sigmoid(z)

    y = conv_bn_silu(x, params["cv1"])
    ok, identity = y[:, :c_ok], y[:, c_ok:]

    p = params["m"]
    out0 = jax.nn.gelu(_conv2d_nchw(ok, p["in_w"], p["in_b"]), approximate=False)

    fac_pool = jnp.mean(out0, axis=(2, 3), keepdims=True)
    x_att = _conv2d_nchw(fac_pool, p["fac_w"], p["fac_b"])
    x_fca = jnp.abs(jnp.fft.ifft2(x_att * jnp.fft.fft2(out0)))

    pool = jnp.mean(x_fca, axis=(2, 3), keepdims=True)
    x_att2 = _conv2d_nchw(pool, p["conv_w"], p["conv_b"])
    x_sca = x_att2 * x_fca

    x1 = _conv2d_nchw(x_sca, p["fgm_d1_w"], p["fgm_d1_b"])
    x2 = _conv2d_nchw(x_sca, p["fgm_d2_w"], p["fgm_d2_b"])
    fgm_out = jnp.abs(jnp.fft.ifft2(x1 * jnp.fft.fft2(x2)))
    x_sca2 = fgm_out * p["fgm_alpha"][None] + x_sca * p["fgm_beta"][None]

    C = ok.shape[1]
    d13 = _conv2d_nchw(out0, p["dw13_w"], p["dw13_b"], (0, 15), groups=C)
    d31 = _conv2d_nchw(out0, p["dw31_w"], p["dw31_b"], (15, 0), groups=C)
    d33 = _conv2d_nchw(out0, p["dw33_w"], p["dw33_b"], (15, 15), groups=C)
    d11 = _conv2d_nchw(out0, p["dw11_w"], p["dw11_b"], groups=C)
    o = jnp.maximum(ok + d13 + d31 + d33 + d11 + x_sca2, 0.0)
    m_out = _conv2d_nchw(o, p["out_w"], p["out_b"])

    cat = jnp.concatenate([m_out, identity], axis=1)
    return conv_bn_silu(cat, params["cv2"])


# ---------------------------------------------------------------------------
# Parameter construction + self-test
# ---------------------------------------------------------------------------
def make_params(key, dim, c_ok):
    it = iter(jax.random.split(key, 40))

    def nrm(shape, scale=0.1):
        return scale * jax.random.normal(next(it), shape, jnp.float32)

    def conv_bn(c_in, c_out):
        return {
            "w": nrm((c_out, c_in, 1, 1)),
            "gamma": 1.0 + nrm((c_out,)),
            "beta": nrm((c_out,)),
            "mean": nrm((c_out,)),
            "var": jnp.abs(jax.random.normal(next(it), (c_out,), jnp.float32)) + 0.5,
        }

    c = c_ok
    m = {
        "in_w": nrm((c, c, 1, 1)), "in_b": nrm((c,)),
        "out_w": nrm((c, c, 1, 1)), "out_b": nrm((c,)),
        "dw13_w": nrm((c, 1, 1, 31)), "dw13_b": nrm((c,)),
        "dw31_w": nrm((c, 1, 31, 1)), "dw31_b": nrm((c,)),
        "dw33_w": nrm((c, 1, 31, 31), 0.02), "dw33_b": nrm((c,)),
        "dw11_w": nrm((c, 1, 1, 1)), "dw11_b": nrm((c,)),
        "conv_w": nrm((c, c, 1, 1)), "conv_b": nrm((c,)),
        "fac_w": nrm((c, c, 1, 1)), "fac_b": nrm((c,)),
        "fgm_d1_w": nrm((c, c, 1, 1)), "fgm_d1_b": nrm((c,)),
        "fgm_d2_w": nrm((c, c, 1, 1)), "fgm_d2_b": nrm((c,)),
        "fgm_alpha": nrm((c, 1, 1)), "fgm_beta": 1.0 + nrm((c, 1, 1)),
    }
    return {"cv1": conv_bn(dim, dim), "cv2": conv_bn(dim, dim), "m": m}


if __name__ == "__main__":
    # CSPOmniKernel(dim=16, e=0.25) -> OmniKernel runs on 4 channels.
    N, DIM, H, W = 2, 16, 16, 16
    E = 0.25
    C_OK = int(DIM * E)

    key = jax.random.PRNGKey(0)
    key_p, key_x = jax.random.split(key)
    params = make_params(key_p, DIM, C_OK)
    x = jax.random.normal(key_x, (N, DIM, H, W), jnp.float32)

    fwd_f32 = jax.jit(functools.partial(csp_omnikernel_forward, e=E))
    ref_fn = jax.jit(functools.partial(csp_omnikernel_reference, e=E))

    out = jax.block_until_ready(fwd_f32(x, params))
    ref = jax.block_until_ready(ref_fn(x, params))

    assert out.shape == (N, DIM, H, W), out.shape
    max_err = float(jnp.max(jnp.abs(out - ref)))
    assert jnp.allclose(out, ref, atol=1e-3, rtol=1e-3), f"f32 max abs err {max_err}"

    # bf16-streamed variant (halves HBM traffic on the mem-bound matmuls); looser check.
    fwd_bf16 = jax.jit(functools.partial(csp_omnikernel_forward, e=E, dtype=jnp.bfloat16))
    out_bf16 = jax.block_until_ready(fwd_bf16(x, params))
    bf16_err = float(jnp.max(jnp.abs(out_bf16 - ref)))
    assert bf16_err < 5e-2, f"bf16 max abs err {bf16_err}"

    print("KERNEL_OK")
</pallas_src>

<mosaic_0001>
module attributes {stable_mosaic.version = 11 : i64} {
  func.func @_pw_conv_kernel(%arg0: i32, %arg1: memref<16x256xf32, #tpu.memory_space<vmem>>, %arg2: memref<16x16xf32, #tpu.memory_space<vmem>>, %arg3: memref<16x1xf32, #tpu.memory_space<vmem>>, %arg4: memref<16x256xf32, #tpu.memory_space<vmem>>) attributes {dimension_semantics = [#tpu.dimension_semantics<parallel>], iteration_bounds = array<i64: 2>, scalar_prefetch = 0 : i64, scratch_operands = 0 : i64, tpu.core_type = #tpu.core_type<tc>, window_params = [{transform_indices = @transform_0, window_bounds = array<i64: 16, 256>}, {pipeline_mode = #tpu.pipeline_mode<synchronous>, transform_indices = @transform_1, window_bounds = array<i64: 16, 16>}, {pipeline_mode = #tpu.pipeline_mode<synchronous>, transform_indices = @transform_2, window_bounds = array<i64: 16, 1>}, {transform_indices = @transform_3, window_bounds = array<i64: 16, 256>}]} {
    %c0 = arith.constant 0 : index
    %c0_0 = arith.constant 0 : index
    %0 = vector.load %arg2[%c0, %c0_0] : memref<16x16xf32, #tpu.memory_space<vmem>>, vector<16x16xf32>
    %c0_1 = arith.constant 0 : index
    %c0_2 = arith.constant 0 : index
    %1 = vector.load %arg1[%c0_1, %c0_2] : memref<16x256xf32, #tpu.memory_space<vmem>>, vector<16x256xf32>
    %2 = vector.extract_strided_slice %0 {offsets = [0, 0], sizes = [16, 1], strides = [1, 1]} : vector<16x16xf32> to vector<16x1xf32>
    %3 = vector.extract_strided_slice %1 {offsets = [0, 0], sizes = [1, 256], strides = [1, 1]} : vector<16x256xf32> to vector<1x256xf32>
    %4 = vector.broadcast %2 : vector<16x1xf32> to vector<16x256xf32>
    %5 = vector.broadcast %3 : vector<1x256xf32> to vector<16x256xf32>
    %6 = arith.mulf %4, %5 : vector<16x256xf32>
    %7 = vector.extract_strided_slice %0 {offsets = [0, 1], sizes = [16, 1], strides = [1, 1]} : vector<16x16xf32> to vector<16x1xf32>
    %8 = vector.extract_strided_slice %1 {offsets = [1, 0], sizes = [1, 256], strides = [1, 1]} : vector<16x256xf32> to vector<1x256xf32>
    %9 = vector.broadcast %7 : vector<16x1xf32> to vector<16x256xf32>
    %10 = vector.broadcast %8 : vector<1x256xf32> to vector<16x256xf32>
    %11 = arith.mulf %9, %10 : vector<16x256xf32>
    %12 = arith.addf %6, %11 : vector<16x256xf32>
    %13 = vector.extract_strided_slice %0 {offsets = [0, 2], sizes = [16, 1], strides = [1, 1]} : vector<16x16xf32> to vector<16x1xf32>
    %14 = vector.extract_strided_slice %1 {offsets = [2, 0], sizes = [1, 256], strides = [1, 1]} : vector<16x256xf32> to vector<1x256xf32>
    %15 = vector.broadcast %13 : vector<16x1xf32> to vector<16x256xf32>
    %16 = vector.broadcast %14 : vector<1x256xf32> to vector<16x256xf32>
    %17 = arith.mulf %15, %16 : vector<16x256xf32>
    %18 = arith.addf %12, %17 : vector<16x256xf32>
    %19 = vector.extract_strided_slice %0 {offsets = [0, 3], sizes = [16, 1], strides = [1, 1]} : vector<16x16xf32> to vector<16x1xf32>
    %20 = vector.extract_strided_slice %1 {offsets = [3, 0], sizes = [1, 256], strides = [1, 1]} : vector<16x256xf32> to vector<1x256xf32>
    %21 = vector.broadcast %19 : vector<16x1xf32> to vector<16x256xf32>
    %22 = vector.broadcast %20 : vector<1x256xf32> to vector<16x256xf32>
    %23 = arith.mulf %21, %22 : vector<16x256xf32>
    %24 = arith.addf %18, %23 : vector<16x256xf32>
    %25 = vector.extract_strided_slice %0 {offsets = [0, 4], sizes = [16, 1], strides = [1, 1]} : vector<16x16xf32> to vector<16x1xf32>
    %26 = vector.extract_strided_slice %1 {offsets = [4, 0], sizes = [1, 256], strides = [1, 1]} : vector<16x256xf32> to vector<1x256xf32>
    %27 = vector.broadcast %25 : vector<16x1xf32> to vector<16x256xf32>
    %28 = vector.broadcast %26 : vector<1x256xf32> to vector<16x256xf32>
    %29 = arith.mulf %27, %28 : vector<16x256xf32>
    %30 = arith.addf %24, %29 : vector<16x256xf32>
    %31 = vector.extract_strided_slice %0 {offsets = [0, 5], sizes = [16, 1], strides = [1, 1]} : vector<16x16xf32> to vector<16x1xf32>
    %32 = vector.extract_strided_slice %1 {offsets = [5, 0], sizes = [1, 256], strides = [1, 1]} : vector<16x256xf32> to vector<1x256xf32>
    %33 = vector.broadcast %31 : vector<16x1xf32> to vector<16x256xf32>
    %34 = vector.broadcast %32 : vector<1x256xf32> to vector<16x256xf32>
    %35 = arith.mulf %33, %34 : vector<16x256xf32>
    %36 = arith.addf %30, %35 : vector<16x256xf32>
    %37 = vector.extract_strided_slice %0 {offsets = [0, 6], sizes = [16, 1], strides = [1, 1]} : vector<16x16xf32> to vector<16x1xf32>
    %38 = vector.extract_strided_slice %1 {offsets = [6, 0], sizes = [1, 256], strides = [1, 1]} : vector<16x256xf32> to vector<1x256xf32>
    %39 = vector.broadcast %37 : vector<16x1xf32> to vector<16x256xf32>
    %40 = vector.broadcast %38 : vector<1x256xf32> to vector<16x256xf32>
    %41 = arith.mulf %39, %40 : vector<16x256xf32>
    %42 = arith.addf %36, %41 : vector<16x256xf32>
    %43 = vector.extract_strided_slice %0 {offsets = [0, 7], sizes = [16, 1], strides = [1, 1]} : vector<16x16xf32> to vector<16x1xf32>
    %44 = vector.extract_strided_slice %1 {offsets = [7, 0], sizes = [1, 256], strides = [1, 1]} : vector<16x256xf32> to vector<1x256xf32>
    %45 = vector.broadcast %43 : vector<16x1xf32> to vector<16x256xf32>
    %46 = vector.broadcast %44 : vector<1x256xf32> to vector<16x256xf32>
    %47 = arith.mulf %45, %46 : vector<16x256xf32>
    %48 = arith.addf %42, %47 : vector<16x256xf32>
    %49 = vector.extract_strided_slice %0 {offsets = [0, 8], sizes = [16, 1], strides = [1, 1]} : vector<16x16xf32> to vector<16x1xf32>
    %50 = vector.extract_strided_slice %1 {offsets = [8, 0], sizes = [1, 256], strides = [1, 1]} : vector<16x256xf32> to vector<1x256xf32>
    %51 = vector.broadcast %49 : vector<16x1xf32> to vector<16x256xf32>
    %52 = vector.broadcast %50 : vector<1x256xf32> to vector<16x256xf32>
    %53 = arith.mulf %51, %52 : vector<16x256xf32>
    %54 = arith.addf %48, %53 : vector<16x256xf32>
    %55 = vector.extract_strided_slice %0 {offsets = [0, 9], sizes = [16, 1], strides = [1, 1]} : vector<16x16xf32> to vector<16x1xf32>
    %56 = vector.extract_strided_slice %1 {offsets = [9, 0], sizes = [1, 256], strides = [1, 1]} : vector<16x256xf32> to vector<1x256xf32>
    %57 = vector.broadcast %55 : vector<16x1xf32> to vector<16x256xf32>
    %58 = vector.broadcast %56 : vector<1x256xf32> to vector<16x256xf32>
    %59 = arith.mulf %57, %58 : vector<16x256xf32>
    %60 = arith.addf %54, %59 : vector<16x256xf32>
    %61 = vector.extract_strided_slice %0 {offsets = [0, 10], sizes = [16, 1], strides = [1, 1]} : vector<16x16xf32> to vector<16x1xf32>
    %62 = vector.extract_strided_slice %1 {offsets = [10, 0], sizes = [1, 256], strides = [1, 1]} : vector<16x256xf32> to vector<1x256xf32>
    %63 = vector.broadcast %61 : vector<16x1xf32> to vector<16x256xf32>
    %64 = vector.broadcast %62 : vector<1x256xf32> to vector<16x256xf32>
    %65 = arith.mulf %63, %64 : vector<16x256xf32>
    %66 = arith.addf %60, %65 : vector<16x256xf32>
    %67 = vector.extract_strided_slice %0 {offsets = [0, 11], sizes = [16, 1], strides = [1, 1]} : vector<16x16xf32> to vector<16x1xf32>
    %68 = vector.extract_strided_slice %1 {offsets = [11, 0], sizes = [1, 256], strides = [1, 1]} : vector<16x256xf32> to vector<1x256xf32>
    %69 = vector.broadcast %67 : vector<16x1xf32> to vector<16x256xf32>
    %70 = vector.broadcast %68 : vector<1x256xf32> to vector<16x256xf32>
    %71 = arith.mulf %69, %70 : vector<16x256xf32>
    %72 = arith.addf %66, %71 : vector<16x256xf32>
    %73 = vector.extract_strided_slice %0 {offsets = [0, 12], sizes = [16, 1], strides = [1, 1]} : vector<16x16xf32> to vector<16x1xf32>
    %74 = vector.extract_strided_slice %1 {offsets = [12, 0], sizes = [1, 256], strides = [1, 1]} : vector<16x256xf32> to vector<1x256xf32>
    %75 = vector.broadcast %73 : vector<16x1xf32> to vector<16x256xf32>
    %76 = vector.broadcast %74 : vector<1x256xf32> to vector<16x256xf32>
    %77 = arith.mulf %75, %76 : vector<16x256xf32>
    %78 = arith.addf %72, %77 : vector<16x256xf32>
    %79 = vector.extract_strided_slice %0 {offsets = [0, 13], sizes = [16, 1], strides = [1, 1]} : vector<16x16xf32> to vector<16x1xf32>
    %80 = vector.extract_strided_slice %1 {offsets = [13, 0], sizes = [1, 256], strides = [1, 1]} : vector<16x256xf32> to vector<1x256xf32>
    %81 = vector.broadcast %79 : vector<16x1xf32> to vector<16x256xf32>
    %82 = vector.broadcast %80 : vector<1x256xf32> to vector<16x256xf32>
    %83 = arith.mulf %81, %82 : vector<16x256xf32>
    %84 = arith.addf %78, %83 : vector<16x256xf32>
    %85 = vector.extract_strided_slice %0 {offsets = [0, 14], sizes = [16, 1], strides = [1, 1]} : vector<16x16xf32> to vector<16x1xf32>
    %86 = vector.extract_strided_slice %1 {offsets = [14, 0], sizes = [1, 256], strides = [1, 1]} : vector<16x256xf32> to vector<1x256xf32>
    %87 = vector.broadcast %85 : vector<16x1xf32> to vector<16x256xf32>
    %88 = vector.broadcast %86 : vector<1x256xf32> to vector<16x256xf32>
    %89 = arith.mulf %87, %88 : vector<16x256xf32>
    %90 = arith.addf %84, %89 : vector<16x256xf32>
    %91 = vector.extract_strided_slice %0 {offsets = [0, 15], sizes = [16, 1], strides = [1, 1]} : vector<16x16xf32> to vector<16x1xf32>
    %92 = vector.extract_strided_slice %1 {offsets = [15, 0], sizes = [1, 256], strides = [1, 1]} : vector<16x256xf32> to vector<1x256xf32>
    %93 = vector.broadcast %91 : vector<16x1xf32> to vector<16x256xf32>
    %94 = vector.broadcast %92 : vector<1x256xf32> to vector<16x256xf32>
    %95 = arith.mulf %93, %94 : vector<16x256xf32>
    %96 = arith.addf %90, %95 : vector<16x256xf32>
    %c0_3 = arith.constant 0 : index
    %c0_4 = arith.constant 0 : index
    %97 = vector.load %arg3[%c0_3, %c0_4] : memref<16x1xf32, #tpu.memory_space<vmem>>, vector<16x1xf32>
    %98 = vector.broadcast %97 : vector<16x1xf32> to vector<16x256xf32>
    %99 = arith.addf %96, %98 : vector<16x256xf32>
    %100 = arith.negf %99 : vector<16x256xf32>
    %101 = math.exp %100 : vector<16x256xf32>
    %cst = arith.constant 1.000000e+00 : f32
    %102 = vector.broadcast %cst : f32 to vector<16x256xf32>
    %103 = arith.addf %102, %101 : vector<16x256xf32>
    %104 = arith.divf %102, %103 : vector<16x256xf32>
    %105 = arith.mulf %99, %104 : vector<16x256xf32>
    %c0_5 = arith.constant 0 : index
    %c0_6 = arith.constant 0 : index
    %106 = vector.load %arg4[%c0_5, %c0_6] : memref<16x256xf32, #tpu.memory_space<vmem>>, vector<16x256xf32>
    tpu.vector_store %arg4[%c0_5, %c0_6], %105 {strides = array<i32>} : memref<16x256xf32, #tpu.memory_space<vmem>>, vector<16x256xf32>,
    return
  }
  func.func @transform_0(%arg0: i32) -> (i32, i32) {
    %c0_i32 = arith.constant 0 : i32
    %c0_i32_0 = arith.constant 0 : i32
    return %c0_i32, %arg0 : i32, i32
  }
  func.func @transform_1(%arg0: i32) -> (i32, i32) {
    %c0_i32 = arith.constant 0 : i32
    %c0_i32_0 = arith.constant 0 : i32
    %c0_i32_1 = arith.constant 0 : i32
    return %c0_i32, %c0_i32_0 : i32, i32
  }
  func.func @transform_2(%arg0: i32) -> (i32, i32) {
    %c0_i32 = arith.constant 0 : i32
    %c0_i32_0 = arith.constant 0 : i32
    %c0_i32_1 = arith.constant 0 : i32
    return %c0_i32, %c0_i32_0 : i32, i32
  }
  func.func @transform_3(%arg0: i32) -> (i32, i32) {
    %c0_i32 = arith.constant 0 : i32
    %c0_i32_0 = arith.constant 0 : i32
    return %c0_i32, %arg0 : i32, i32
  }
}

module attributes {stable_mosaic.version = 11 : i64} {
  func.func @_pw_conv_kernel(%arg0: i32, %arg1: memref<4x256xf32, #tpu.memory_space<vmem>>, %arg2: memref<4x4xf32, #tpu.memory_space<vmem>>, %arg3: memref<4x1xf32, #tpu.memory_space<vmem>>, %arg4: memref<4x256xf32, #tpu.memory_space<vmem>>) attributes {dimension_semantics = [#tpu.dimension_semantics<parallel>], iteration_bounds = array<i64: 2>, scalar_prefetch = 0 : i64, scratch_operands = 0 : i64, tpu.core_type = #tpu.core_type<tc>, window_params = [{transform_indices = @transform_0, window_bounds = array<i64: 4, 256>}, {pipeline_mode = #tpu.pipeline_mode<synchronous>, transform_indices = @transform_1, window_bounds = array<i64: 4, 4>}, {pipeline_mode = #tpu.pipeline_mode<synchronous>, transform_indices = @transform_2, window_bounds = array<i64: 4, 1>}, {transform_indices = @transform_3, window_bounds = array<i64: 4, 256>}]} {
    %c0 = arith.constant 0 : index
    %c0_0 = arith.constant 0 : index
    %0 = vector.load %arg2[%c0, %c0_0] : memref<4x4xf32, #tpu.memory_space<vmem>>, vector<4x4xf32>
    %c0_1 = arith.constant 0 : index
    %c0_2 = arith.constant 0 : index
    %1 = vector.load %arg1[%c0_1, %c0_2] : memref<4x256xf32, #tpu.memory_space<vmem>>, vector<4x256xf32>
    %2 = vector.extract_strided_slice %0 {offsets = [0, 0], sizes = [4, 1], strides = [1, 1]} : vector<4x4xf32> to vector<4x1xf32>
    %3 = vector.extract_strided_slice %1 {offsets = [0, 0], sizes = [1, 256], strides = [1, 1]} : vector<4x256xf32> to vector<1x256xf32>
    %4 = vector.broadcast %2 : vector<4x1xf32> to vector<4x256xf32>
    %5 = vector.broadcast %3 : vector<1x256xf32> to vector<4x256xf32>
    %6 = arith.mulf %4, %5 : vector<4x256xf32>
    %7 = vector.extract_strided_slice %0 {offsets = [0, 1], sizes = [4, 1], strides = [1, 1]} : vector<4x4xf32> to vector<4x1xf32>
    %8 = vector.extract_strided_slice %1 {offsets = [1, 0], sizes = [1, 256], strides = [1, 1]} : vector<4x256xf32> to vector<1x256xf32>
    %9 = vector.broadcast %7 : vector<4x1xf32> to vector<4x256xf32>
    %10 = vector.broadcast %8 : vector<1x256xf32> to vector<4x256xf32>
    %11 = arith.mulf %9, %10 : vector<4x256xf32>
    %12 = arith.addf %6, %11 : vector<4x256xf32>
    %13 = vector.extract_strided_slice %0 {offsets = [0, 2], sizes = [4, 1], strides = [1, 1]} : vector<4x4xf32> to vector<4x1xf32>
    %14 = vector.extract_strided_slice %1 {offsets = [2, 0], sizes = [1, 256], strides = [1, 1]} : vector<4x256xf32> to vector<1x256xf32>
    %15 = vector.broadcast %13 : vector<4x1xf32> to vector<4x256xf32>
    %16 = vector.broadcast %14 : vector<1x256xf32> to vector<4x256xf32>
    %17 = arith.mulf %15, %16 : vector<4x256xf32>
    %18 = arith.addf %12, %17 : vector<4x256xf32>
    %19 = vector.extract_strided_slice %0 {offsets = [0, 3], sizes = [4, 1], strides = [1, 1]} : vector<4x4xf32> to vector<4x1xf32>
    %20 = vector.extract_strided_slice %1 {offsets = [3, 0], sizes = [1, 256], strides = [1, 1]} : vector<4x256xf32> to vector<1x256xf32>
    %21 = vector.broadcast %19 : vector<4x1xf32> to vector<4x256xf32>
    %22 = vector.broadcast %20 : vector<1x256xf32> to vector<4x256xf32>
    %23 = arith.mulf %21, %22 : vector<4x256xf32>
    %24 = arith.addf %18, %23 : vector<4x256xf32>
    %c0_3 = arith.constant 0 : index
    %c0_4 = arith.constant 0 : index
    %25 = vector.load %arg3[%c0_3, %c0_4] : memref<4x1xf32, #tpu.memory_space<vmem>>, vector<4x1xf32>
    %26 = vector.broadcast %25 : vector<4x1xf32> to vector<4x256xf32>
    %27 = arith.addf %24, %26 : vector<4x256xf32>
    %cst = arith.constant 5.000000e-01 : f32
    %28 = vector.broadcast %cst : f32 to vector<4x256xf32>
    %29 = arith.mulf %28, %27 : vector<4x256xf32>
    %cst_5 = arith.constant 0.707106769 : f32
    %30 = vector.broadcast %cst_5 : f32 to vector<4x256xf32>
    %31 = arith.mulf %27, %30 : vector<4x256xf32>
    %32 = math.absf %31 : vector<4x256xf32>
    %cst_6 = arith.constant 0.327591091 : f32
    %33 = vector.broadcast %cst_6 : f32 to vector<4x256xf32>
    %34 = arith.mulf %33, %32 : vector<4x256xf32>
    %cst_7 = arith.constant 1.000000e+00 : f32
    %35 = vector.broadcast %cst_7 : f32 to vector<4x256xf32>
    %36 = arith.addf %35, %34 : vector<4x256xf32>
    %cst_8 = arith.constant 1.000000e+00 : f32
    %37 = vector.broadcast %cst_8 : f32 to vector<4x256xf32>
    %38 = arith.divf %37, %36 : vector<4x256xf32>
    %cst_9 = arith.constant 1.06140542 : f32
    %39 = vector.broadcast %cst_9 : f32 to vector<4x256xf32>
    %40 = arith.mulf %39, %38 : vector<4x256xf32>
    %cst_10 = arith.constant -1.45315206 : f32
    %41 = vector.broadcast %cst_10 : f32 to vector<4x256xf32>
    %42 = arith.addf %40, %41 : vector<4x256xf32>
    %43 = arith.mulf %42, %38 : vector<4x256xf32>
    %cst_11 = arith.constant 1.42141378 : f32
    %44 = vector.broadcast %cst_11 : f32 to vector<4x256xf32>
    %45 = arith.addf %43, %44 : vector<4x256xf32>
    %46 = arith.mulf %45, %38 : vector<4x256xf32>
    %cst_12 = arith.constant -0.284496725 : f32
    %47 = vector.broadcast %cst_12 : f32 to vector<4x256xf32>
    %48 = arith.addf %46, %47 : vector<4x256xf32>
    %49 = arith.mulf %48, %38 : vector<4x256xf32>
    %cst_13 = arith.constant 0.254829586 : f32
    %50 = vector.broadcast %cst_13 : f32 to vector<4x256xf32>
    %51 = arith.addf %49, %50 : vector<4x256xf32>
    %52 = arith.mulf %51, %38 : vector<4x256xf32>
    %cst_14 = arith.constant 0.000000e+00 : f32
    %53 = vector.broadcast %cst_14 : f32 to vector<4x256xf32>
    %54 = arith.subf %53, %32 : vector<4x256xf32>
    %55 = arith.mulf %54, %32 : vector<4x256xf32>
    %56 = math.exp %55 : vector<4x256xf32>
    %57 = arith.mulf %52, %56 : vector<4x256xf32>
    %cst_15 = arith.constant 1.000000e+00 : f32
    %58 = vector.broadcast %cst_15 : f32 to vector<4x256xf32>
    %59 = arith.subf %58, %57 : vector<4x256xf32>
    %cst_16 = arith.constant 0.000000e+00 : f32
    %60 = vector.broadcast %cst_16 : f32 to vector<4x256xf32>
    %61 = arith.cmpf oge, %31, %60 : vector<4x256xf32>
    %cst_17 = arith.constant 0.000000e+00 : f32
    %62 = vector.broadcast %cst_17 : f32 to vector<4x256xf32>
    %63 = arith.subf %62, %59 : vector<4x256xf32>
    %64 = arith.select %61, %59, %63 : vector<4x256xi1>, vector<4x256xf32>
    %cst_18 = arith.constant 1.000000e+00 : f32
    %65 = vector.broadcast %cst_18 : f32 to vector<4x256xf32>
    %66 = arith.addf %65, %64 : vector<4x256xf32>
    %67 = arith.mulf %29, %66 : vector<4x256xf32>
    %c0_19 = arith.constant 0 : index
    %c0_20 = arith.constant 0 : index
    %68 = vector.load %arg4[%c0_19, %c0_20] : memref<4x256xf32, #tpu.memory_space<vmem>>, vector<4x256xf32>
    tpu.vector_store %arg4[%c0_19, %c0_20], %67 {strides = array<i32>} : memref<4x256xf32, #tpu.memory_space<vmem>>, vector<4x256xf32>,
    return
  }
  func.func @transform_0(%arg0: i32) -> (i32, i32) {
    %c0_i32 = arith.constant 0 : i32
    %c0_i32_0 = arith.constant 0 : i32
    return %c0_i32, %arg0 : i32, i32
  }
  func.func @transform_1(%arg0: i32) -> (i32, i32) {
    %c0_i32 = arith.constant 0 : i32
    %c0_i32_0 = arith.constant 0 : i32
    %c0_i32_1 = arith.constant 0 : i32
    return %c0_i32, %c0_i32_0 : i32, i32
  }
  func.func @transform_2(%arg0: i32) -> (i32, i32) {
    %c0_i32 = arith.constant 0 : i32
    %c0_i32_0 = arith.constant 0 : i32
    %c0_i32_1 = arith.constant 0 : i32
    return %c0_i32, %c0_i32_0 : i32, i32
  }
  func.func @transform_3(%arg0: i32) -> (i32, i32) {
    %c0_i32 = arith.constant 0 : i32
    %c0_i32_0 = arith.constant 0 : i32
    return %c0_i32, %arg0 : i32, i32
  }
}

module attributes {stable_mosaic.version = 11 : i64} {
  func.func @_pw_conv_kernel(%arg0: i32, %arg1: memref<4x256xf32, #tpu.memory_space<vmem>>, %arg2: memref<8x4xf32, #tpu.memory_space<vmem>>, %arg3: memref<8x1xf32, #tpu.memory_space<vmem>>, %arg4: memref<8x256xf32, #tpu.memory_space<vmem>>) attributes {dimension_semantics = [#tpu.dimension_semantics<parallel>], iteration_bounds = array<i64: 2>, scalar_prefetch = 0 : i64, scratch_operands = 0 : i64, tpu.core_type = #tpu.core_type<tc>, window_params = [{transform_indices = @transform_0, window_bounds = array<i64: 4, 256>}, {pipeline_mode = #tpu.pipeline_mode<synchronous>, transform_indices = @transform_1, window_bounds = array<i64: 8, 4>}, {pipeline_mode = #tpu.pipeline_mode<synchronous>, transform_indices = @transform_2, window_bounds = array<i64: 8, 1>}, {transform_indices = @transform_3, window_bounds = array<i64: 8, 256>}]} {
    %c0 = arith.constant 0 : index
    %c0_0 = arith.constant 0 : index
    %0 = vector.load %arg2[%c0, %c0_0] : memref<8x4xf32, #tpu.memory_space<vmem>>, vector<8x4xf32>
    %c0_1 = arith.constant 0 : index
    %c0_2 = arith.constant 0 : index
    %1 = vector.load %arg1[%c0_1, %c0_2] : memref<4x256xf32, #tpu.memory_space<vmem>>, vector<4x256xf32>
    %2 = vector.extract_strided_slice %0 {offsets = [0, 0], sizes = [8, 1], strides = [1, 1]} : vector<8x4xf32> to vector<8x1xf32>
    %3 = vector.extract_strided_slice %1 {offsets = [0, 0], sizes = [1, 256], strides = [1, 1]} : vector<4x256xf32> to vector<1x256xf32>
    %4 = vector.broadcast %2 : vector<8x1xf32> to vector<8x256xf32>
    %5 = vector.broadcast %3 : vector<1x256xf32> to vector<8x256xf32>
    %6 = arith.mulf %4, %5 : vector<8x256xf32>
    %7 = vector.extract_strided_slice %0 {offsets = [0, 1], sizes = [8, 1], strides = [1, 1]} : vector<8x4xf32> to vector<8x1xf32>
    %8 = vector.extract_strided_slice %1 {offsets = [1, 0], sizes = [1, 256], strides = [1, 1]} : vector<4x256xf32> to vector<1x256xf32>
    %9 = vector.broadcast %7 : vector<8x1xf32> to vector<8x256xf32>
    %10 = vector.broadcast %8 : vector<1x256xf32> to vector<8x256xf32>
    %11 = arith.mulf %9, %10 : vector<8x256xf32>
    %12 = arith.addf %6, %11 : vector<8x256xf32>
    %13 = vector.extract_strided_slice %0 {offsets = [0, 2], sizes = [8, 1], strides = [1, 1]} : vector<8x4xf32> to vector<8x1xf32>
    %14 = vector.extract_strided_slice %1 {offsets = [2, 0], sizes = [1, 256], strides = [1, 1]} : vector<4x256xf32> to vector<1x256xf32>
    %15 = vector.broadcast %13 : vector<8x1xf32> to vector<8x256xf32>
    %16 = vector.broadcast %14 : vector<1x256xf32> to vector<8x256xf32>
    %17 = arith.mulf %15, %16 : vector<8x256xf32>
    %18 = arith.addf %12, %17 : vector<8x256xf32>
    %19 = vector.extract_strided_slice %0 {offsets = [0, 3], sizes = [8, 1], strides = [1, 1]} : vector<8x4xf32> to vector<8x1xf32>
    %20 = vector.extract_strided_slice %1 {offsets = [3, 0], sizes = [1, 256], strides = [1, 1]} : vector<4x256xf32> to vector<1x256xf32>
    %21 = vector.broadcast %19 : vector<8x1xf32> to vector<8x256xf32>
    %22 = vector.broadcast %20 : vector<1x256xf32> to vector<8x256xf32>
    %23 = arith.mulf %21, %22 : vector<8x256xf32>
    %24 = arith.addf %18, %23 : vector<8x256xf32>
    %c0_3 = arith.constant 0 : index
    %c0_4 = arith.constant 0 : index
    %25 = vector.load %arg3[%c0_3, %c0_4] : memref<8x1xf32, #tpu.memory_space<vmem>>, vector<8x1xf32>
    %26 = vector.broadcast %25 : vector<8x1xf32> to vector<8x256xf32>
    %27 = arith.addf %24, %26 : vector<8x256xf32>
    %c0_5 = arith.constant 0 : index
    %c0_6 = arith.constant 0 : index
    %28 = vector.load %arg4[%c0_5, %c0_6] : memref<8x256xf32, #tpu.memory_space<vmem>>, vector<8x256xf32>
    tpu.vector_store %arg4[%c0_5, %c0_6], %27 {strides = array<i32>} : memref<8x256xf32, #tpu.memory_space<vmem>>, vector<8x256xf32>,
    return
  }
  func.func @transform_0(%arg0: i32) -> (i32, i32) {
    %c0_i32 = arith.constant 0 : i32
    %c0_i32_0 = arith.constant 0 : i32
    return %c0_i32, %arg0 : i32, i32
  }
  func.func @transform_1(%arg0: i32) -> (i32, i32) {
    %c0_i32 = arith.constant 0 : i32
    %c0_i32_0 = arith.constant 0 : i32
    %c0_i32_1 = arith.constant 0 : i32
    return %c0_i32, %c0_i32_0 : i32, i32
  }
  func.func @transform_2(%arg0: i32) -> (i32, i32) {
    %c0_i32 = arith.constant 0 : i32
    %c0_i32_0 = arith.constant 0 : i32
    %c0_i32_1 = arith.constant 0 : i32
    return %c0_i32, %c0_i32_0 : i32, i32
  }
  func.func @transform_3(%arg0: i32) -> (i32, i32) {
    %c0_i32 = arith.constant 0 : i32
    %c0_i32_0 = arith.constant 0 : i32
    return %c0_i32, %arg0 : i32, i32
  }
}

module attributes {stable_mosaic.version = 11 : i64} {
  func.func @_ok_epilogue_kernel(%arg0: i32, %arg1: memref<4x256xf32, #tpu.memory_space<vmem>>, %arg2: memref<4x256xf32, #tpu.memory_space<vmem>>, %arg3: memref<4x256xf32, #tpu.memory_space<vmem>>, %arg4: memref<4x256xf32, #tpu.memory_space<vmem>>, %arg5: memref<4x256xf32, #tpu.memory_space<vmem>>, %arg6: memref<4x256xf32, #tpu.memory_space<vmem>>, %arg7: memref<4x256xf32, #tpu.memory_space<vmem>>, %arg8: memref<4x1xf32, #tpu.memory_space<vmem>>, %arg9: memref<4x1xf32, #tpu.memory_space<vmem>>, %arg10: memref<4x1xf32, #tpu.memory_space<vmem>>, %arg11: memref<4x1xf32, #tpu.memory_space<vmem>>, %arg12: memref<4x4xf32, #tpu.memory_space<vmem>>, %arg13: memref<4x1xf32, #tpu.memory_space<vmem>>, %arg14: memref<4x256xf32, #tpu.memory_space<vmem>>) attributes {dimension_semantics = [#tpu.dimension_semantics<parallel>], iteration_bounds = array<i64: 2>, scalar_prefetch = 0 : i64, scratch_operands = 0 : i64, tpu.core_type = #tpu.core_type<tc>, window_params = [{transform_indices = @transform_0, window_bounds = array<i64: 4, 256>}, {transform_indices = @transform_1, window_bounds = array<i64: 4, 256>}, {transform_indices = @transform_2, window_bounds = array<i64: 4, 256>}, {transform_indices = @transform_3, window_bounds = array<i64: 4, 256>}, {transform_indices = @transform_4, window_bounds = array<i64: 4, 256>}, {transform_indices = @transform_5, window_bounds = array<i64: 4, 256>}, {transform_indices = @transform_6, window_bounds = array<i64: 4, 256>}, {pipeline_mode = #tpu.pipeline_mode<synchronous>, transform_indices = @transform_7, window_bounds = array<i64: 4, 1>}, {pipeline_mode = #tpu.pipeline_mode<synchronous>, transform_indices = @transform_8, window_bounds = array<i64: 4, 1>}, {pipeline_mode = #tpu.pipeline_mode<synchronous>, transform_indices = @transform_9, window_bounds = array<i64: 4, 1>}, {pipeline_mode = #tpu.pipeline_mode<synchronous>, transform_indices = @transform_10, window_bounds = array<i64: 4, 1>}, {pipeline_mode = #tpu.pipeline_mode<synchronous>, transform_indices = @transform_11, window_bounds = array<i64: 4, 4>}, {pipeline_mode = #tpu.pipeline_mode<synchronous>, transform_indices = @transform_12, window_bounds = array<i64: 4, 1>}, {transform_indices = @transform_13, window_bounds = array<i64: 4, 256>}]} {
    %c0 = arith.constant 0 : index
    %c0_0 = arith.constant 0 : index
    %0 = vector.load %arg1[%c0, %c0_0] : memref<4x256xf32, #tpu.memory_space<vmem>>, vector<4x256xf32>
    %c0_1 = arith.constant 0 : index
    %c0_2 = arith.constant 0 : index
    %1 = vector.load %arg3[%c0_1, %c0_2] : memref<4x256xf32, #tpu.memory_space<vmem>>, vector<4x256xf32>
    %2 = arith.addf %0, %1 : vector<4x256xf32>
    %c0_3 = arith.constant 0 : index
    %c0_4 = arith.constant 0 : index
    %3 = vector.load %arg4[%c0_3, %c0_4] : memref<4x256xf32, #tpu.memory_space<vmem>>, vector<4x256xf32>
    %4 = arith.addf %2, %3 : vector<4x256xf32>
    %c0_5 = arith.constant 0 : index
    %c0_6 = arith.constant 0 : index
    %5 = vector.load %arg5[%c0_5, %c0_6] : memref<4x256xf32, #tpu.memory_space<vmem>>, vector<4x256xf32>
    %6 = arith.addf %4, %5 : vector<4x256xf32>
    %c0_7 = arith.constant 0 : index
    %c0_8 = arith.constant 0 : index
    %7 = vector.load %arg2[%c0_7, %c0_8] : memref<4x256xf32, #tpu.memory_space<vmem>>, vector<4x256xf32>
    %c0_9 = arith.constant 0 : index
    %c0_10 = arith.constant 0 : index
    %8 = vector.load %arg8[%c0_9, %c0_10] : memref<4x1xf32, #tpu.memory_space<vmem>>, vector<4x1xf32>
    %9 = vector.broadcast %8 : vector<4x1xf32> to vector<4x256xf32>
    %10 = arith.mulf %7, %9 : vector<4x256xf32>
    %11 = arith.addf %6, %10 : vector<4x256xf32>
    %c0_11 = arith.constant 0 : index
    %c0_12 = arith.constant 0 : index
    %12 = vector.load %arg9[%c0_11, %c0_12] : memref<4x1xf32, #tpu.memory_space<vmem>>, vector<4x1xf32>
    %13 = vector.broadcast %12 : vector<4x1xf32> to vector<4x256xf32>
    %14 = arith.addf %11, %13 : vector<4x256xf32>
    %c0_13 = arith.constant 0 : index
    %c0_14 = arith.constant 0 : index
    %15 = vector.load %arg6[%c0_13, %c0_14] : memref<4x256xf32, #tpu.memory_space<vmem>>, vector<4x256xf32>
    %c0_15 = arith.constant 0 : index
    %c0_16 = arith.constant 0 : index
    %16 = vector.load %arg10[%c0_15, %c0_16] : memref<4x1xf32, #tpu.memory_space<vmem>>, vector<4x1xf32>
    %17 = vector.broadcast %16 : vector<4x1xf32> to vector<4x256xf32>
    %18 = arith.mulf %15, %17 : vector<4x256xf32>
    %19 = arith.addf %14, %18 : vector<4x256xf32>
    %c0_17 = arith.constant 0 : index
    %c0_18 = arith.constant 0 : index
    %20 = vector.load %arg7[%c0_17, %c0_18] : memref<4x256xf32, #tpu.memory_space<vmem>>, vector<4x256xf32>
    %c0_19 = arith.constant 0 : index
    %c0_20 = arith.constant 0 : index
    %21 = vector.load %arg11[%c0_19, %c0_20] : memref<4x1xf32, #tpu.memory_space<vmem>>, vector<4x1xf32>
    %22 = vector.broadcast %21 : vector<4x1xf32> to vector<4x256xf32>
    %23 = arith.mulf %20, %22 : vector<4x256xf32>
    %24 = arith.addf %19, %23 : vector<4x256xf32>
    %cst = arith.constant 0.000000e+00 : f32
    %25 = vector.broadcast %cst : f32 to vector<4x256xf32>
    %26 = arith.maximumf %24, %25 : vector<4x256xf32>
    %c0_21 = arith.constant 0 : index
    %c0_22 = arith.constant 0 : index
    %27 = vector.load %arg12[%c0_21, %c0_22] : memref<4x4xf32, #tpu.memory_space<vmem>>, vector<4x4xf32>
    %28 = vector.extract_strided_slice %27 {offsets = [0, 0], sizes = [4, 1], strides = [1, 1]} : vector<4x4xf32> to vector<4x1xf32>
    %29 = vector.extract_strided_slice %26 {offsets = [0, 0], sizes = [1, 256], strides = [1, 1]} : vector<4x256xf32> to vector<1x256xf32>
    %30 = vector.broadcast %28 : vector<4x1xf32> to vector<4x256xf32>
    %31 = vector.broadcast %29 : vector<1x256xf32> to vector<4x256xf32>
    %32 = arith.mulf %30, %31 : vector<4x256xf32>
    %33 = vector.extract_strided_slice %27 {offsets = [0, 1], sizes = [4, 1], strides = [1, 1]} : vector<4x4xf32> to vector<4x1xf32>
    %34 = vector.extract_strided_slice %26 {offsets = [1, 0], sizes = [1, 256], strides = [1, 1]} : vector<4x256xf32> to vector<1x256xf32>
    %35 = vector.broadcast %33 : vector<4x1xf32> to vector<4x256xf32>
    %36 = vector.broadcast %34 : vector<1x256xf32> to vector<4x256xf32>
    %37 = arith.mulf %35, %36 : vector<4x256xf32>
    %38 = arith.addf %32, %37 : vector<4x256xf32>
    %39 = vector.extract_strided_slice %27 {offsets = [0, 2], sizes = [4, 1], strides = [1, 1]} : vector<4x4xf32> to vector<4x1xf32>
    %40 = vector.extract_strided_slice %26 {offsets = [2, 0], sizes = [1, 256], strides = [1, 1]} : vector<4x256xf32> to vector<1x256xf32>
    %41 = vector.broadcast %39 : vector<4x1xf32> to vector<4x256xf32>
    %42 = vector.broadcast %40 : vector<1x256xf32> to vector<4x256xf32>
    %43 = arith.mulf %41, %42 : vector<4x256xf32>
    %44 = arith.addf %38, %43 : vector<4x256xf32>
    %45 = vector.extract_strided_slice %27 {offsets = [0, 3], sizes = [4, 1], strides = [1, 1]} : vector<4x4xf32> to vector<4x1xf32>
    %46 = vector.extract_strided_slice %26 {offsets = [3, 0], sizes = [1, 256], strides = [1, 1]} : vector<4x256xf32> to vector<1x256xf32>
    %47 = vector.broadcast %45 : vector<4x1xf32> to vector<4x256xf32>
    %48 = vector.broadcast %46 : vector<1x256xf32> to vector<4x256xf32>
    %49 = arith.mulf %47, %48 : vector<4x256xf32>
    %50 = arith.addf %44, %49 : vector<4x256xf32>
    %c0_23 = arith.constant 0 : index
    %c0_24 = arith.constant 0 : index
    %51 = vector.load %arg13[%c0_23, %c0_24] : memref<4x1xf32, #tpu.memory_space<vmem>>, vector<4x1xf32>
    %52 = vector.broadcast %51 : vector<4x1xf32> to vector<4x256xf32>
    %53 = arith.addf %50, %52 : vector<4x256xf32>
    %c0_25 = arith.constant 0 : index
    %c0_26 = arith.constant 0 : index
    %54 = vector.load %arg14[%c0_25, %c0_26] : memref<4x256xf32, #tpu.memory_space<vmem>>, vector<4x256xf32>
    tpu.vector_store %arg14[%c0_25, %c0_26], %53 {strides = array<i32>} : memref<4x256xf32, #tpu.memory_space<vmem>>, vector<4x256xf32>,
    return
  }
  func.func @transform_0(%arg0: i32) -> (i32, i32) {
    %c0_i32 = arith.constant 0 : i32
    %c0_i32_0 = arith.constant 0 : i32
    return %c0_i32, %arg0 : i32, i32
  }
  func.func @transform_1(%arg0: i32) -> (i32, i32) {
    %c0_i32 = arith.constant 0 : i32
    %c0_i32_0 = arith.constant 0 : i32
    return %c0_i32, %arg0 : i32, i32
  }
  func.func @transform_2(%arg0: i32) -> (i32, i32) {
    %c0_i32 = arith.constant 0 : i32
    %c0_i32_0 = arith.constant 0 : i32
    return %c0_i32, %arg0 : i32, i32
  }
  func.func @transform_3(%arg0: i32) -> (i32, i32) {
    %c0_i32 = arith.constant 0 : i32
    %c0_i32_0 = arith.constant 0 : i32
    return %c0_i32, %arg0 : i32, i32
  }
  func.func @transform_4(%arg0: i32) -> (i32, i32) {
    %c0_i32 = arith.constant 0 : i32
    %c0_i32_0 = arith.constant 0 : i32
    return %c0_i32, %arg0 : i32, i32
  }
  func.func @transform_5(%arg0: i32) -> (i32, i32) {
    %c0_i32 = arith.constant 0 : i32
    %c0_i32_0 = arith.constant 0 : i32
    return %c0_i32, %arg0 : i32, i32
  }
  func.func @transform_6(%arg0: i32) -> (i32, i32) {
    %c0_i32 = arith.constant 0 : i32
    %c0_i32_0 = arith.constant 0 : i32
    return %c0_i32, %arg0 : i32, i32
  }
  func.func @transform_7(%arg0: i32) -> (i32, i32) {
    %c0_i32 = arith.constant 0 : i32
    %c0_i32_0 = arith.constant 0 : i32
    %c0_i32_1 = arith.constant 0 : i32
    return %c0_i32, %c0_i32_0 : i32, i32
  }
  func.func @transform_8(%arg0: i32) -> (i32, i32) {
    %c0_i32 = arith.constant 0 : i32
    %c0_i32_0 = arith.constant 0 : i32
    %c0_i32_1 = arith.constant 0 : i32
    return %c0_i32, %c0_i32_0 : i32, i32
  }
  func.func @transform_9(%arg0: i32) -> (i32, i32) {
    %c0_i32 = arith.constant 0 : i32
    %c0_i32_0 = arith.constant 0 : i32
    %c0_i32_1 = arith.constant 0 : i32
    return %c0_i32, %c0_i32_0 : i32, i32
  }
  func.func @transform_10(%arg0: i32) -> (i32, i32) {
    %c0_i32 = arith.constant 0 : i32
    %c0_i32_0 = arith.constant 0 : i32
    %c0_i32_1 = arith.constant 0 : i32
    return %c0_i32, %c0_i32_0 : i32, i32
  }
  func.func @transform_11(%arg0: i32) -> (i32, i32) {
    %c0_i32 = arith.constant 0 : i32
    %c0_i32_0 = arith.constant 0 : i32
    %c0_i32_1 = arith.constant 0 : i32
    return %c0_i32, %c0_i32_0 : i32, i32
  }
  func.func @transform_12(%arg0: i32) -> (i32, i32) {
    %c0_i32 = arith.constant 0 : i32
    %c0_i32_0 = arith.constant 0 : i32
    %c0_i32_1 = arith.constant 0 : i32
    return %c0_i32, %c0_i32_0 : i32, i32
  }
  func.func @transform_13(%arg0: i32) -> (i32, i32) {
    %c0_i32 = arith.constant 0 : i32
    %c0_i32_0 = arith.constant 0 : i32
    return %c0_i32, %arg0 : i32, i32
  }
}

</mosaic_0001>

<bundles_post_ra>
// kernel: csp_omnikernel_forward.6
= control target key start
LH: loop header
LB: loop body
LE: loop exit
PB: predicated region body
PF: predicated region fallthrough
CT: control target
= control target key end

     0   :  { %s452_s12 = smov 0   ;;  %s498_s0 = inlined_call_operand.vmem [shape: f32[4,512], index: 0, kind: input, shape index: {}]   ;;  %s499_s1 = inlined_call_operand.vmem [shape: f32[4,4], index: 1, kind: input, shape index: {}]   ;;  %s500_s2 = inlined_call_operand.vmem [shape: f32[4,1], index: 2, kind: input, shape index: {}]   ;;  %s501_s3 = inlined_call_operand.vmem [shape: f32[4,512], index: 3, kind: output, shape index: {}]  }
   0x1 LB: > { %s383_s13 = sadd.s32 4294967295, %s426_s12   ;;  %p387_p0 = scmp.ge.s32.totalorder %s426_s12, 1  ;;  %s426_s12 = sphi %s452_s12, %s13_s12  }
   0x2   : > { %p138_p1 = scmp.lt.s32.totalorder %s426_s12, 3 }
   0x4   : > { %p139_p2 = pnand %p387_p0, %p138_p1 }
   0x5   : > { %s388_s18 = sshll.u32 (!%p139_p2), %s383_s13, 1 }
   0x6   : > { %142 = sbr.rel (%p139_p2) target bundleno = 206 (0xce), region = 32  ;;  %p163_p3 = scmp.lt.s32.totalorder (!%p139_p2), %s388_s18, 3 }
   0xb   : > { %v174_v0 = vld [vmem:[%s499_s1] sm:$0xf]  ;;  %v428_v1 = vmov 0   ;;  %v429_v2 = vmov 2   ;;  %v430_v4 = vmov 1   ;;  %v431_v5 = vmov 3  }
   0xc   : > { %406 = vset.pattern.permute.xlu0 %v428_v1  ;;  %408 = vset.pattern.permute.xlu1 %v429_v2  ;;  %v232_v3 = vld [vmem:[%s500_s2] sm:$0xf]  ;;  %s503_s18 = smov (!%p163_p3, %s388_s18), 3  ;;  %vm323_vm10 = vcmask 1043456  }
   0xd   : > { %178 = vperm.xlu0 %406, %v174_v0   ;;  %205 = vperm.xlu1 %408, %v174_v0   ;;  %s389_s19 = sshll.u32 %s503_s18, 2 }
   0xe   : > { %410 = vset.pattern.permute.xlu2 %v428_v1  ;;  %s166_s22 = scalar_lea.vmem %s498_s0, %s389_s19  ;;  %s172_s25 = scalar_lea.vmem %s501_s3, %s389_s19 }
   0xf   : > { %235 = vperm.xlu2 %410, %v232_v3   ;;  %v175_v6 = vld [vmem:[%s166_s22] sm:$0xff] }
  0x10   : > { %v182_v9 = vperm.slane %v175_v6, 0  ;;  %v183_v10 = vperm.slane %v175_v6, 4  ;;  %v194_v11 = vperm.slane %v175_v6, 1  ;;  %v195_v12 = vperm.slane %v175_v6, 5 }
  0x11   : > { %v208_v13 = vperm.slane %v175_v6, 2  ;;  %v209_v14 = vperm.slane %v175_v6, 6  ;;  %v222_v15 = vperm.slane %v175_v6, 3  ;;  %v223_v16 = vperm.slane %v175_v6, 7 }
  0x12   : > { %v186_v17 = vperm.slane %v182_v9, 0  ;;  %v187_v18 = vperm.slane %v183_v10, 0  ;;  %v198_v19 = vperm.slane %v194_v11, 1  ;;  %v199_v20 = vperm.slane %v195_v12, 1 }
  0x13   : > { %v212_v21 = vperm.slane %v208_v13, 2  ;;  %v213_v22 = vperm.slane %v209_v14, 2  ;;  %v226_v23 = vperm.slane %v222_v15, 3  ;;  %v227_v24 = vperm.slane %v223_v16, 3 }
  0x15   : > { %407 = vset.pattern.permute.xlu0 %v430_v4  ;;  %409 = vset.pattern.permute.xlu1 %v431_v5 }
  0x16   : > { %191 = vperm.xlu0 %407, %v174_v0   ;;  %219 = vperm.xlu1 %409, %v174_v0  }
  0x1e   : > { %411 = vset.pattern.permute.xlu0 %v428_v1 }
  0x69   : > { %v236_v39 = vpop.permute.xlu2 %235 }
  0x7f   : > { %v179_v7 = vpop.permute.xlu0 %178  ;;  %v206_v8 = vpop.permute.xlu1 %205 }
  0x80   : > { %v188_v27 = vmul.f32 %v186_v17, %v179_v7  ;;  %v189_v28 = vmul.f32 %v187_v18, %v179_v7  ;;  %v214_v31 = vmul.f32 %v212_v21, %v206_v8  ;;  %v215_v32 = vmul.f32 %v213_v22, %v206_v8 }
  0x88   : > { %v192_v25 = vpop.permute.xlu0 %191  ;;  %v220_v26 = vpop.permute.xlu1 %219 }
  0x89   : > { %v200_v29 = vmul.f32 %v198_v19, %v192_v25  ;;  %v201_v30 = vmul.f32 %v199_v20, %v192_v25  ;;  %v228_v35 = vmul.f32 %v226_v23, %v220_v26  ;;  %v229_v36 = vmul.f32 %v227_v24, %v220_v26 }
  0x8b   : > { %v202_v33 = vadd.f32 %v200_v29, %v188_v27  ;;  %v203_v34 = vadd.f32 %v201_v30, %v189_v28 }
  0x8d   : > { %v216_v37 = vadd.f32 %v214_v31, %v202_v33  ;;  %v217_v38 = vadd.f32 %v215_v32, %v203_v34 }
  0x8f   : > { %v230_v40 = vadd.f32 %v228_v35, %v216_v37  ;;  %v231_v41 = vadd.f32 %v229_v36, %v217_v38 }
  0x91   : > { %v474_v42 = vadd.f32 %v236_v39, %v230_v40  ;;  %v476_v43 = vadd.f32 %v236_v39, %v231_v41 }
  0x93   : > { %v479_v44 = vmul.f32 0.70710677, %v474_v42  ;;  %v482_v45 = vmul.f32 0.70710677, %v476_v43 }
  0x95   : > { %v244_v46 = vand.u32 2147483647, %v479_v44  ;;  %v245_v47 = vand.u32 2147483647, %v482_v45  ;;  %vm310_vm8 = vcmp.ge.f32.partialorder %v479_v44, 0.0  ;;  %vm311_vm9 = vcmp.ge.f32.partialorder %v482_v45, 0.0 }
  0x97   : > { %v246_v48 = vmul.f32 0.3275911, %v244_v46  ;;  %v247_v49 = vmul.f32 0.3275911, %v245_v47  ;;  %v298_v7 = vsub.f32 0.0, %v244_v46  ;;  %v299_v10 = vsub.f32 0.0, %v245_v47 }
  0x99   : > { %v248_v50 = vadd.f32 1.0, %v246_v48  ;;  %v249_v51 = vadd.f32 1.0, %v247_v49  ;;  %v300_v14 = vmul.f32 %v298_v7, %v244_v46  ;;  %v301_v16 = vmul.f32 %v299_v10, %v245_v47 }
  0x9a   : > { %v241_v46 = vmul.f32 0.5, %v476_v43  ;;  %v240_v49 = vmul.f32 0.5, %v474_v42 }
  0x9b   : > { %412 = vrcp.f32 %v248_v50  ;;  %v261_v57 = vand.u32 2147483648, %v248_v50  ;;  %v259_v60 = vand.u32 2147483647, %v248_v50  ;;  %v276_v61 = vand.u32 2147483648, %v249_v51 }
  0x9c   : > { %414 = vrcp.f32 %v249_v51  ;;  %v274_v63 = vand.u32 2147483647, %v249_v51  ;;  %vm255_vm2 = vweird.f32 %v248_v50  ;;  %vm270_vm4 = vweird.f32 %v249_v51 }
  0x9d   : > { %v262_v1 = vor.u32 1.1754944e-38, %v261_v57  ;;  %vm260_vm5 = vcmp.eq.f32.partialorder %v259_v60, 8.507059e+37  ;;  %v277_v4 = vor.u32 1.1754944e-38, %v276_v61  ;;  %v302_v20 = vmul.f32 1.442695, %v300_v14 }
  0x9e   : > { %vm275_vm7 = vcmp.eq.f32.partialorder %v274_v63, 8.507059e+37  ;;  %v304_v22 = vmul.f32 1.442695, %v301_v16 }
  0x9f   : > { %416 = vpow2.f32 %v302_v20 }
  0xa0   : > { %418 = vpow2.f32 %v304_v22 }
  0xa1   : > { %v413_v52 = vpop.eup %412 }
  0xa2   : > { %v415_v53 = vpop.eup %414  ;;  %v251_v54 = vmul.f32 %v413_v52, %v248_v50  ;;  %vm256_vm0 = vweird.f32 %v413_v52 }
  0xa3   : > { %v266_v55 = vmul.f32 %v415_v53, %v249_v51  ;;  %vm271_vm1 = vweird.f32 %v415_v53  ;;  %vm257_vm3 = vmor %vm255_vm2, %vm256_vm0 }
  0xa4   : > { %v252_v56 = vsub.f32 1.0, %v251_v54  ;;  %vm272_vm6 = vmor %vm270_vm4, %vm271_vm1 }
  0xa5   : > { %v267_v58 = vsub.f32 1.0, %v266_v55  ;;  %v417_v31 = vpop.eup %416 }
  0xa6   : > { %v253_v59 = vmul.f32 %v413_v52, %v252_v56  ;;  %v419_v33 = vpop.eup %418 }
  0xa7   : > { %v268_v62 = vmul.f32 %v415_v53, %v267_v58 }
  0xa8   : > { %v254_v0 = vadd.f32 %v413_v52, %v253_v59 }
  0xa9   : > { %v269_v2 = vadd.f32 %v415_v53, %v268_v62 }
  0xaa   : > { %v258_v3 = vsel %vm257_vm3, %v413_v52, %v254_v0 }
  0xab   : > { %v263_v5 = vsel %vm260_vm5, %v262_v1, %v258_v3  ;;  %v273_v6 = vsel %vm272_vm6, %v415_v53, %v269_v2 }
  0xac   : > { %v278_v8 = vsel %vm275_vm7, %v277_v4, %v273_v6  ;;  %v280_v9 = vmul.f32 1.0614054, %v263_v5 }
  0xad   : > { %v281_v11 = vmul.f32 1.0614054, %v278_v8 }
  0xae   : > { %v282_v12 = vadd.f32 -1.4531521, %v280_v9 }
  0xaf   : > { %v283_v13 = vadd.f32 -1.4531521, %v281_v11 }
  0xb0   : > { %v284_v15 = vmul.f32 %v282_v12, %v263_v5 }
  0xb1   : > { %v285_v17 = vmul.f32 %v283_v13, %v278_v8 }
  0xb2   : > { %v286_v18 = vadd.f32 1.4214138, %v284_v15 }
  0xb3   : > { %v287_v19 = vadd.f32 1.4214138, %v285_v17 }
  0xb4   : > { %v288_v21 = vmul.f32 %v286_v18, %v263_v5 }
  0xb5   : > { %v289_v23 = vmul.f32 %v287_v19, %v278_v8 }
  0xb6   : > { %v290_v24 = vadd.f32 -0.28449672, %v288_v21 }
  0xb7   : > { %v291_v25 = vadd.f32 -0.28449672, %v289_v23 }
  0xb8   : > { %v292_v26 = vmul.f32 %v290_v24, %v263_v5 }
  0xb9   : > { %v293_v27 = vmul.f32 %v291_v25, %v278_v8 }
  0xba   : > { %v294_v28 = vadd.f32 0.2548296, %v292_v26 }
  0xbb   : > { %v295_v29 = vadd.f32 0.2548296, %v293_v27 }
  0xbc   : > { %v296_v30 = vmul.f32 %v294_v28, %v263_v5 }
  0xbd   : > { %v297_v32 = vmul.f32 %v295_v29, %v278_v8 }
  0xbe   : > { %v306_v34 = vmul.f32 %v417_v31, %v296_v30 }
  0xbf   : > { %v307_v35 = vmul.f32 %v419_v33, %v297_v32 }
  0xc0   : > { %v308_v36 = vsub.f32 1.0, %v306_v34 }
  0xc1   : > { %v309_v37 = vsub.f32 1.0, %v307_v35 }
  0xc2   : > { %v312_v38 = vsub.f32 0.0, %v308_v36 }
  0xc3   : > { %v313_v39 = vsub.f32 0.0, %v309_v37 }
  0xc4   : > { %v314_v40 = vsel %vm310_vm8, %v308_v36, %v312_v38 }
  0xc5   : > { %v315_v41 = vsel %vm311_vm9, %v309_v37, %v313_v39  ;;  %v316_v47 = vadd.f32 1.0, %v314_v40 }
  0xc6   : > { %v317_v48 = vadd.f32 1.0, %v315_v41 }
  0xc7   : > { %v318_v51 = vmul.f32 %v316_v47, %v240_v49 }
  0xc8   : > { %v319_v50 = vmul.f32 %v317_v48, %v241_v46 }
  0xca   : > { %v322_v44 = vrot.slane %v319_v50, 4 }
  0xcc   : > { %v324_v52 = vsel %vm323_vm10, %v318_v51, %v322_v44 }
  0xcd   : > { %326 = vst [vmem:[%s172_s25] sm:$0xff] %v324_v52 }
  0xce PF: > { %s13_s12 = sadd.s32 1, %s426_s12  }
  0xcf   : > { %p10_p4 = scmp.ge.s32.totalorder %s13_s12, 4  }
  0xd1   :  { %12 = sbr.rel (!%p10_p4) target bundleno = 1 (0x1), region = 62 }

// kernel: csp_omnikernel_forward.5
= control target key start
LH: loop header
LB: loop body
LE: loop exit
PB: predicated region body
PF: predicated region fallthrough
CT: control target
= control target key end

     0   :  { %s843_s12 = smov 0   ;;  %s845_s13 = smov 0   ;;  %s1070_s0 = inlined_call_operand.vmem [shape: f32[16,512], index: 0, kind: input, shape index: {}]   ;;  %s1071_s1 = inlined_call_operand.vmem [shape: f32[16,16], index: 1, kind: input, shape index: {}]   ;;  %s1072_s2 = inlined_call_operand.vmem [shape: f32[16,1], index: 2, kind: input, shape index: {}]   ;;  %s1073_s3 = inlined_call_operand.vmem [shape: f32[16,512], index: 3, kind: output, shape index: {}]  }
   0x1   :  { %s847_s14 = smov 0  }
   0x2 LB: > { %s674_s15 = sadd.s32 4294967295, %s805_s14   ;;  %s860_s16 = sadd.s32 1, %s805_s14   ;;  %s805_s14 = sphi %s847_s14, %s1081_s14   ;;  %s801_s13 = sphi %s845_s13, %s1080_s13   ;;  %s797_s12 = sphi %s843_s12, %s1079_s12  }
   0x3   : > { %s17_s17 = ssub.s32 %s805_s14, %s860_s16  ;;  %s20_s18 = sadd.s32 1, %s801_s13 }
   0x4   : > { %p18_p0 = scmp.eq.s32.totalorder %s17_s17, 0  ;;  %p27_p1 = scmp.ne.s32.totalorder %s801_s13, %s797_s12 }
   0x5   : > { %p28_p2 = scmp.eq.s32.totalorder %s805_s14, 0  ;;  %p99_p3 = scmp.eq.s32.totalorder %s674_s15, 1 }
   0x6   : > { %s871_s19 = scalar_select %p18_p0, %s801_s13, %s20_s18  }
   0x7   : > { %p29_p4 = por %p28_p2, %p27_p1  ;;  %p873_p5 = por %p99_p3, %p27_p1 }
   0x8   : > { %p677_p6 = scmp.ge.s32.totalorder %s805_s14, 2 }
   0xa   : > { %127 = sbr.rel (%p677_p6) target bundleno = 23 (0x17), region = 24 }
   0xf   : > { %130 = sbr.rel (!%p29_p4) target bundleno = 23 (0x17), region = 28  ;;  %s132_s21 = sand.u32 (%p29_p4), 1, %s801_s13  }
  0x10   : > { %s693_s22 = sshll.u32 (%p29_p4), %s805_s14, 4  ;;  %s678_s23 = sshll.u32 (%p29_p4), %s132_s21, 5 }
  0x11   : > { %s137_s26 = scalar_lea.vmem (%p29_p4), %s1070_s0, %s693_s22  ;;  %s134_s27 = scalar_lea.vmem (%p29_p4), [#allocation2], %s678_s23 }
  0x12   : > { %v150_v0 = vld [vmem:[%s137_s26] sm:$0xff] (%p29_p4)  ;;  %v152_v1 = vld [vmem:[%s137_s26 + $0x8] sm:$0xff] (%p29_p4) }
  0x13   : > { %v154_v2 = vld [vmem:[%s137_s26 + $0x20] sm:$0xff] (%p29_p4)  ;;  %151 = vst [vmem:[%s134_s27] sm:$0xff] (%p29_p4), %v150_v0  ;;  %v156_v3 = vld [vmem:[%s137_s26 + $0x28] sm:$0xff] (%p29_p4) }
  0x14   : > { %153 = vst [vmem:[%s134_s27 + $0x8] sm:$0xff] %v152_v1 }
  0x15   : > { %155 = vst [vmem:[%s134_s27 + $0x10] sm:$0xff] %v154_v2 }
  0x16   : > { %157 = vst [vmem:[%s134_s27 + $0x18] sm:$0xff] %v156_v3 }
  0x17 PF: > { %p681_p7 = scmp.ge.s32.totalorder %s805_s14, 1  ;;  %p162_p8 = scmp.lt.s32.totalorder %s805_s14, 3 }
  0x19   : > { %p163_p9 = pnand %p681_p7, %p162_p8 }
  0x1a   : > { %s169_s5 = sand.u32 (!%p163_p9), 1, %s797_s12  }
  0x1b   : > { %166 = sbr.rel (%p163_p9) target bundleno = 298 (0x12a), region = 51  ;;  %s930_s6 = sshll.u32 (!%p163_p9), %s169_s5, 5 }
  0x1c   : > { %s940_s11 = scalar_lea.vmem (!%p163_p9), [#allocation2], %s930_s6  ;;  %s190_s12 = scalar_lea.vmem (!%p163_p9), [#allocation3], %s930_s6 }
  0x20   : > { %v888_v4 = vld [vmem:[%s1071_s1] sm:$0xff]  ;;  %v807_v5 = vmov 1   ;;  %v808_v6 = vmov 0   ;;  %v809_v7 = vmov 2   ;;  %v897_v8 = vld [vmem:[%s1071_s1 + $0x8] sm:$0xff]  ;;  %v810_v9 = vmov 3  }
  0x21   : > { %736 = vset.pattern.permute.xlu1 %v807_v5  ;;  %735 = vset.pattern.permute.xlu0 %v808_v6  ;;  %v811_v10 = vmov 4   ;;  %v812_v11 = vmov 5   ;;  %v813_v12 = vmov 6   ;;  %v814_v13 = vmov 8   ;;  %v485_v23 = vld [vmem:[%s1072_s2] sm:$0xff]  ;;  %v486_v24 = vld [vmem:[%s1072_s2 + $0x8] sm:$0xff] }
  0x22   : > { %216 = vperm.xlu1 %736, %v888_v4   ;;  %201 = vperm.xlu0 %735, %v888_v4   ;;  %v815_v14 = vmov 7   ;;  %v816_v15 = vmov 10   ;;  %v817_v16 = vmov 13   ;;  %v818_v17 = vmov 9   ;;  %v943_v25 = vld [vmem:[%s940_s11] sm:$0xff]  ;;  %v946_v26 = vld [vmem:[%s940_s11 + $0x8] sm:$0xff] }
  0x23   : > { %737 = vset.pattern.permute.xlu2 %v809_v7  ;;  %v819_v18 = vmov 15   ;;  %v820_v19 = vmov 11   ;;  %v821_v20 = vmov 12   ;;  %v822_v21 = vmov 14   ;;  %s694_s17 = sshll.u32 (%p873_p5), %s674_s15, 4 }
  0x24   : > { %234 = vperm.xlu2 %737, %v888_v4   ;;  %v223_v27 = vperm.slane %v943_v25, 1  ;;  %v224_v28 = vperm.slane %v946_v26, 1  ;;  %v209_v29 = vperm.slane %v943_v25, 0  ;;  %v210_v30 = vperm.slane %v946_v26, 0  ;;  %s594_s22 = scalar_lea.vmem (%p873_p5), %s1073_s3, %s694_s17 }
  0x25   : > { %v241_v31 = vperm.slane %v943_v25, 2  ;;  %v242_v32 = vperm.slane %v946_v26, 2  ;;  %v259_v63 = vperm.slane %v943_v25, 3  ;;  %v260_v0 = vperm.slane %v946_v26, 3 }
  0x26   : > { %v278_v5 = vperm.slane %v946_v26, 4 }
  0x2a   : > { %220 = vperm.xlu1 %736, %v897_v8   ;;  %206 = vperm.xlu0 %735, %v897_v8  }
  0x2c   : > { %238 = vperm.xlu2 %737, %v897_v8  }
  0x32   : > { %739 = vset.pattern.permute.xlu1 %v810_v9  ;;  %738 = vset.pattern.permute.xlu0 %v810_v9 }
  0x33   : > { %256 = vperm.xlu1 %739, %v897_v8   ;;  %252 = vperm.xlu0 %738, %v888_v4  }
  0x34   : > { %740 = vset.pattern.permute.xlu2 %v811_v10 }
  0x35   : > { %270 = vperm.xlu2 %740, %v888_v4  }
  0x3b   : > { %741 = vset.pattern.permute.xlu1 %v811_v10  ;;  %743 = vset.pattern.permute.xlu0 %v812_v11 }
  0x3c   : > { %274 = vperm.xlu1 %741, %v897_v8   ;;  %292 = vperm.xlu0 %743, %v897_v8  }
  0x3d   : > { %742 = vset.pattern.permute.xlu2 %v812_v11 }
  0x3e   : > { %288 = vperm.xlu2 %742, %v888_v4  }
  0x44   : > { %744 = vset.pattern.permute.xlu1 %v813_v12  ;;  %748 = vset.pattern.permute.xlu0 %v814_v13 }
  0x45   : > { %306 = vperm.xlu1 %744, %v888_v4   ;;  %342 = vperm.xlu0 %748, %v888_v4  }
  0x46   : > { %745 = vset.pattern.permute.xlu2 %v813_v12 }
  0x47   : > { %310 = vperm.xlu2 %745, %v897_v8  }
  0x4d   : > { %746 = vset.pattern.permute.xlu1 %v815_v14  ;;  %753 = vset.pattern.permute.xlu0 %v816_v15 }
  0x4e   : > { %324 = vperm.xlu1 %746, %v888_v4   ;;  %382 = vperm.xlu0 %753, %v897_v8  }
  0x4f   : > { %747 = vset.pattern.permute.xlu2 %v815_v14 }
  0x50   : > { %328 = vperm.xlu2 %747, %v897_v8  }
  0x56   : > { %749 = vset.pattern.permute.xlu1 %v814_v13  ;;  %758 = vset.pattern.permute.xlu0 %v817_v16 }
  0x57   : > { %346 = vperm.xlu1 %749, %v897_v8   ;;  %432 = vperm.xlu0 %758, %v888_v4  }
  0x58   : > { %750 = vset.pattern.permute.xlu2 %v818_v17 }
  0x59   : > { %360 = vperm.xlu2 %750, %v888_v4  }
  0x5f   : > { %751 = vset.pattern.permute.xlu1 %v818_v17  ;;  %763 = vset.pattern.permute.xlu0 %v819_v18 }
  0x60   : > { %364 = vperm.xlu1 %751, %v897_v8   ;;  %472 = vperm.xlu0 %763, %v897_v8  }
  0x61   : > { %752 = vset.pattern.permute.xlu2 %v816_v15 }
  0x62   : > { %378 = vperm.xlu2 %752, %v888_v4  }
  0x68   : > { %754 = vset.pattern.permute.xlu1 %v820_v19  ;;  %766 = vset.pattern.permute.xlu0 %v808_v6 }
  0x69   : > { %396 = vperm.xlu1 %754, %v888_v4  }
  0x6a   : > { %755 = vset.pattern.permute.xlu2 %v820_v19  ;;  %v296_v19 = vperm.slane %v946_v26, 5 }
  0x6b   : > { %400 = vperm.xlu2 %755, %v897_v8  }
  0x71   : > { %756 = vset.pattern.permute.xlu1 %v821_v20 }
  0x72   : > { %414 = vperm.xlu1 %756, %v888_v4  }
  0x73   : > { %757 = vset.pattern.permute.xlu2 %v821_v20 }
  0x74   : > { %418 = vperm.xlu2 %757, %v897_v8  }
  0x7a   : > { %759 = vset.pattern.permute.xlu1 %v817_v16 }
  0x7b   : > { %436 = vperm.xlu1 %759, %v897_v8  }
  0x7c   : > { %760 = vset.pattern.permute.xlu2 %v822_v21 }
  0x7d   : > { %450 = vperm.xlu2 %760, %v888_v4  }
  0x7e   : > { %v235_v22 = vpop.permute.xlu2 %234 }
  0x7f   : > { %v243_v40 = vmul.f32 %v241_v31, %v235_v22  ;;  %v244_v41 = vmul.f32 %v242_v32, %v235_v22 }
  0x83   : > { %761 = vset.pattern.permute.xlu1 %v822_v21 }
  0x84   : > { %454 = vperm.xlu1 %761, %v897_v8  }
  0x85   : > { %762 = vset.pattern.permute.xlu2 %v819_v18  ;;  %v295_v18 = vperm.slane %v943_v25, 5 }
  0x86   : > { %468 = vperm.xlu2 %762, %v888_v4   ;;  %v239_v33 = vpop.permute.xlu2 %238  ;;  %v277_v4 = vperm.slane %v943_v25, 4 }
  0x87   : > { %v245_v9 = vmul.f32 %v241_v31, %v239_v33  ;;  %v246_v10 = vmul.f32 %v242_v32, %v239_v33 }
  0x8c   : > { %764 = vset.pattern.permute.xlu1 %v808_v6 }
  0x8d   : > { %489 = vperm.xlu1 %764, %v485_v23  }
  0x8e   : > { %765 = vset.pattern.permute.xlu2 %v808_v6 }
  0x8f   : > { %494 = vperm.xlu2 %765, %v486_v24   ;;  %v271_v47 = vpop.permute.xlu2 %270 }
  0x94   : > { %v217_v34 = vpop.permute.xlu1 %216  ;;  %v202_v35 = vpop.permute.xlu0 %201 }
  0x95   : > { %v225_v36 = vmul.f32 %v223_v27, %v217_v34  ;;  %v226_v37 = vmul.f32 %v224_v28, %v217_v34  ;;  %v211_v38 = vmul.f32 %v209_v29, %v202_v35  ;;  %v212_v39 = vmul.f32 %v210_v30, %v202_v35  ;;  %v978_v35 = vld [vmem:[%s940_s11 + $0x10] sm:$0xff] }
  0x97   : > { %v229_v42 = vadd.f32 %v225_v36, %v211_v38  ;;  %v230_v43 = vadd.f32 %v226_v37, %v212_v39  ;;  %v981_v36 = vld [vmem:[%s940_s11 + $0x18] sm:$0xff] }
  0x98   : > { %v289_v49 = vpop.permute.xlu2 %288 }
  0x99   : > { %v247_v44 = vadd.f32 %v243_v40, %v229_v42  ;;  %v248_v45 = vadd.f32 %v244_v41, %v230_v43  ;;  %v297_v37 = vmul.f32 %v295_v18, %v289_v49  ;;  %v298_v38 = vmul.f32 %v296_v19, %v289_v49 }
  0x9a   : > { %v331_v41 = vperm.slane %v943_v25, 7  ;;  %v332_v42 = vperm.slane %v946_v26, 7 }
  0x9c   : > { %v221_v46 = vpop.permute.xlu1 %220  ;;  %v207_v55 = vpop.permute.xlu0 %206 }
  0x9d   : > { %v227_v59 = vmul.f32 %v223_v27, %v221_v46  ;;  %v228_v60 = vmul.f32 %v224_v28, %v221_v46  ;;  %v213_v61 = vmul.f32 %v209_v29, %v207_v55  ;;  %v214_v62 = vmul.f32 %v210_v30, %v207_v55 }
  0x9e   : > { %v279_v27 = vmul.f32 %v277_v4, %v271_v47  ;;  %v280_v28 = vmul.f32 %v278_v5, %v271_v47  ;;  %v313_v29 = vperm.slane %v943_v25, 6  ;;  %v314_v30 = vperm.slane %v946_v26, 6 }
  0x9f   : > { %v231_v2 = vadd.f32 %v227_v59, %v213_v61  ;;  %v232_v3 = vadd.f32 %v228_v60, %v214_v62  ;;  %v349_v47 = vperm.slane %v978_v35, 0 }
  0xa1   : > { %v311_v51 = vpop.permute.xlu2 %310  ;;  %v249_v14 = vadd.f32 %v245_v9, %v231_v2  ;;  %v250_v15 = vadd.f32 %v246_v10, %v232_v3 }
  0xa2   : > { %v318_v55 = vmul.f32 %v314_v30, %v311_v51 }
  0xa5   : > { %v257_v48 = vpop.permute.xlu1 %256  ;;  %v253_v58 = vpop.permute.xlu0 %252 }
  0xa6   : > { %v261_v6 = vmul.f32 %v259_v63, %v253_v58  ;;  %v262_v7 = vmul.f32 %v260_v0, %v253_v58  ;;  %v263_v11 = vmul.f32 %v259_v63, %v257_v48  ;;  %v264_v12 = vmul.f32 %v260_v0, %v257_v48 }
  0xa7   : > { %v350_v48 = vperm.slane %v981_v36, 0  ;;  %v367_v63 = vperm.slane %v978_v35, 1 }
  0xa8   : > { %v265_v20 = vadd.f32 %v261_v6, %v247_v44  ;;  %v266_v21 = vadd.f32 %v262_v7, %v248_v45  ;;  %v267_v23 = vadd.f32 %v263_v11, %v249_v14  ;;  %v268_v24 = vadd.f32 %v264_v12, %v250_v15 }
  0xa9   : > { %v385_v12 = vperm.slane %v978_v35, 2 }
  0xaa   : > { %v955_v53 = vpop.permute.xlu2 %328  ;;  %v283_v39 = vadd.f32 %v279_v27, %v265_v20  ;;  %v284_v40 = vadd.f32 %v280_v28, %v266_v21  ;;  %v404_v27 = vperm.slane %v981_v36, 3 }
  0xac   : > { %v301_v60 = vadd.f32 %v297_v37, %v283_v39  ;;  %v302_v49 = vadd.f32 %v298_v38, %v284_v40  ;;  %v422_v38 = vperm.slane %v981_v36, 4 }
  0xae   : > { %v275_v50 = vpop.permute.xlu1 %274  ;;  %v293_v13 = vpop.permute.xlu0 %292 }
  0xaf   : > { %v281_v16 = vmul.f32 %v277_v4, %v275_v50  ;;  %v282_v17 = vmul.f32 %v278_v5, %v275_v50  ;;  %v299_v33 = vmul.f32 %v295_v18, %v293_v13  ;;  %v300_v34 = vmul.f32 %v296_v19, %v293_v13 }
  0xb0   : > { %v317_v50 = vmul.f32 %v313_v29, %v311_v51  ;;  %v335_v4 = vmul.f32 %v331_v41, %v955_v53  ;;  %v336_v51 = vmul.f32 %v332_v42, %v955_v53  ;;  %v386_v13 = vperm.slane %v981_v36, 2 }
  0xb1   : > { %v285_v31 = vadd.f32 %v281_v16, %v267_v23  ;;  %v286_v32 = vadd.f32 %v282_v17, %v268_v24  ;;  %v403_v24 = vperm.slane %v978_v35, 3 }
  0xb3   : > { %v959_v56 = vpop.permute.xlu2 %360  ;;  %v303_v58 = vadd.f32 %v299_v33, %v285_v31  ;;  %v304_v59 = vadd.f32 %v300_v34, %v286_v32 }
  0xb4   : > { %v369_v18 = vmul.f32 %v367_v63, %v959_v56 }
  0xb5   : > { %v321_v2 = vadd.f32 %v317_v50, %v303_v58  ;;  %v322_v3 = vadd.f32 %v318_v55, %v304_v59 }
  0xb7   : > { %v307_v52 = vpop.permute.xlu1 %306  ;;  %v343_v43 = vpop.permute.xlu0 %342  ;;  %v339_v15 = vadd.f32 %v335_v4, %v321_v2  ;;  %v340_v16 = vadd.f32 %v336_v51, %v322_v3 }
  0xb8   : > { %v315_v45 = vmul.f32 %v313_v29, %v307_v52  ;;  %v316_v46 = vmul.f32 %v314_v30, %v307_v52  ;;  %v368_v52 = vperm.slane %v981_v36, 1  ;;  %v351_v7 = vmul.f32 %v349_v47, %v343_v43 }
  0xb9   : > { %v352_v9 = vmul.f32 %v350_v48, %v343_v43  ;;  %v440_v43 = vperm.slane %v981_v36, 5 }
  0xba   : > { %v319_v62 = vadd.f32 %v315_v45, %v301_v60  ;;  %v320_v26 = vadd.f32 %v316_v46, %v302_v49  ;;  %v370_v19 = vmul.f32 %v368_v52, %v959_v56  ;;  %v421_v56 = vperm.slane %v978_v35, 4 }
  0xbc   : > { %v965_v1 = vpop.permute.xlu2 %378 }
  0xbd   : > { %v388_v37 = vmul.f32 %v386_v13, %v965_v1 }
  0xc0   : > { %v957_v54 = vpop.permute.xlu1 %324  ;;  %v383_v11 = vpop.permute.xlu0 %382 }
  0xc1   : > { %v333_v61 = vmul.f32 %v331_v41, %v957_v54  ;;  %v334_v25 = vmul.f32 %v332_v42, %v957_v54  ;;  %v389_v31 = vmul.f32 %v385_v12, %v383_v11  ;;  %v390_v32 = vmul.f32 %v386_v13, %v383_v11 }
  0xc2   : > { %v439_v42 = vperm.slane %v978_v35, 5 }
  0xc3   : > { %v337_v5 = vadd.f32 %v333_v61, %v319_v62  ;;  %v338_v6 = vadd.f32 %v334_v25, %v320_v26  ;;  %v457_v61 = vperm.slane %v978_v35, 6 }
  0xc5   : > { %v973_v22 = vpop.permute.xlu2 %400  ;;  %v355_v20 = vadd.f32 %v351_v7, %v337_v5  ;;  %v356_v21 = vadd.f32 %v352_v9, %v338_v6  ;;  %v475_v7 = vperm.slane %v978_v35, 7  ;;  %v476_v9 = vperm.slane %v981_v36, 7 }
  0xc6   : > { %v407_v45 = vmul.f32 %v403_v24, %v973_v22  ;;  %v408_v46 = vmul.f32 %v404_v27, %v973_v22 }
  0xc7   : > { %v373_v33 = vadd.f32 %v369_v18, %v355_v20  ;;  %v374_v34 = vadd.f32 %v370_v19, %v356_v21 }
  0xc9   : > { %v961_v57 = vpop.permute.xlu1 %346  ;;  %v433_v39 = vpop.permute.xlu0 %432 }
  0xca   : > { %v353_v10 = vmul.f32 %v349_v47, %v961_v57  ;;  %v354_v54 = vmul.f32 %v350_v48, %v961_v57  ;;  %v441_v22 = vmul.f32 %v439_v42, %v433_v39  ;;  %v442_v3 = vmul.f32 %v440_v43, %v433_v39 }
  0xcc   : > { %v357_v23 = vadd.f32 %v353_v10, %v339_v15  ;;  %v358_v57 = vadd.f32 %v354_v54, %v340_v16 }
  0xce   : > { %v419_v0 = vpop.permute.xlu2 %418 }
  0xcf   : > { %v425_v26 = vmul.f32 %v421_v56, %v419_v0 }
  0xd2   : > { %v969_v8 = vpop.permute.xlu1 %364  ;;  %v473_v6 = vpop.permute.xlu0 %472 }
  0xd3   : > { %v371_v17 = vmul.f32 %v367_v63, %v969_v8  ;;  %v372_v53 = vmul.f32 %v368_v52, %v969_v8  ;;  %v387_v8 = vmul.f32 %v385_v12, %v965_v1  ;;  %v392_v1 = vadd.f32 %v388_v37, %v374_v34 }
  0xd4   : > { %v426_v63 = vmul.f32 %v422_v38, %v419_v0  ;;  %v479_v0 = vmul.f32 %v475_v7, %v473_v6  ;;  %v480_v16 = vmul.f32 %v476_v9, %v473_v6 }
  0xd5   : > { %v375_v29 = vadd.f32 %v371_v17, %v357_v23  ;;  %v376_v30 = vadd.f32 %v372_v53, %v358_v57  ;;  %v391_v55 = vadd.f32 %v387_v8, %v373_v33 }
  0xd7   : > { %v451_v28 = vpop.permute.xlu2 %450  ;;  %v393_v47 = vadd.f32 %v389_v31, %v375_v29  ;;  %v394_v48 = vadd.f32 %v390_v32, %v376_v30 }
  0xd8   : > { %v459_v11 = vmul.f32 %v457_v61, %v451_v28 }
  0xd9   : > { %v411_v25 = vadd.f32 %v407_v45, %v393_v47  ;;  %v412_v62 = vadd.f32 %v408_v46, %v394_v48 }
  0xdb   : > { %v397_v44 = vpop.permute.xlu1 %396  ;;  %v429_v10 = vadd.f32 %v425_v26, %v411_v25  ;;  %v430_v54 = vadd.f32 %v426_v63, %v412_v62 }
  0xdc   : > { %v405_v40 = vmul.f32 %v403_v24, %v397_v44  ;;  %v406_v41 = vmul.f32 %v404_v27, %v397_v44  ;;  %v458_v44 = vperm.slane %v981_v36, 6 }
  0xde   : > { %v409_v60 = vadd.f32 %v405_v40, %v391_v55  ;;  %v410_v49 = vadd.f32 %v406_v41, %v392_v1  ;;  %v460_v12 = vmul.f32 %v458_v44, %v451_v28 }
  0xe0   : > { %v469_v4 = vpop.permute.xlu2 %468 }
  0xe1   : > { %v477_v23 = vmul.f32 %v475_v7, %v469_v4  ;;  %v478_v57 = vmul.f32 %v476_v9, %v469_v4 }
  0xe4   : > { %v415_v14 = vpop.permute.xlu1 %414 }
  0xe5   : > { %v423_v58 = vmul.f32 %v421_v56, %v415_v14  ;;  %v424_v59 = vmul.f32 %v422_v38, %v415_v14 }
  0xe7   : > { %v427_v52 = vadd.f32 %v423_v58, %v409_v60  ;;  %v428_v2 = vadd.f32 %v424_v59, %v410_v49 }
  0xe9   : > { %v445_v13 = vadd.f32 %v441_v22, %v427_v52  ;;  %v446_v14 = vadd.f32 %v442_v3, %v428_v2  ;;  %v495_v35 = vpop.permute.xlu2 %494 }
  0xeb   : > { %v463_v24 = vadd.f32 %v459_v11, %v445_v13  ;;  %v464_v36 = vadd.f32 %v460_v12, %v446_v14 }
  0xed   : > { %v437_v50 = vpop.permute.xlu1 %436  ;;  %v481_v31 = vadd.f32 %v477_v23, %v463_v24  ;;  %v482_v32 = vadd.f32 %v478_v57, %v464_v36 }
  0xee   : > { %v443_v51 = vmul.f32 %v439_v42, %v437_v50  ;;  %v444_v5 = vmul.f32 %v440_v43, %v437_v50 }
  0xf0   : > { %v447_v17 = vadd.f32 %v443_v51, %v429_v10  ;;  %v448_v53 = vadd.f32 %v444_v5, %v430_v54 }
  0xf6   : > { %v455_v15 = vpop.permute.xlu1 %454 }
  0xf7   : > { %v461_v18 = vmul.f32 %v457_v61, %v455_v15  ;;  %v462_v19 = vmul.f32 %v458_v44, %v455_v15 }
  0xf9   : > { %v465_v20 = vadd.f32 %v461_v18, %v447_v17  ;;  %v466_v21 = vadd.f32 %v462_v19, %v448_v53 }
  0xfb   : > { %v483_v27 = vadd.f32 %v479_v0, %v465_v20  ;;  %v484_v29 = vadd.f32 %v480_v16, %v466_v21 }
  0xfd   : > { %v1015_v30 = vadd.f32 %v495_v35, %v483_v27  ;;  %v1017_v28 = vadd.f32 %v495_v35, %v484_v29 }
  0xff   : > { %v686_v33 = vmul.f32 -1.442695, %v1015_v30  ;;  %v687_v34 = vmul.f32 -1.442695, %v1017_v28  ;;  %v490_v8 = vpop.permute.xlu1 %489 }
 0x100   : > { %v1021_v37 = vadd.f32 %v490_v8, %v481_v31  ;;  %v1023_v56 = vadd.f32 %v490_v8, %v482_v32 }
 0x101   : > { %767 = vpow2.f32 %v686_v33 }
 0x102   : > { %769 = vpow2.f32 %v687_v34  ;;  %v684_v38 = vmul.f32 -1.442695, %v1021_v37  ;;  %v685_v39 = vmul.f32 -1.442695, %v1023_v56 }
 0x104   : > { %771 = vpow2.f32 %v684_v38 }
 0x105   : > { %773 = vpow2.f32 %v685_v39 }
 0x107   : > { %v768_v40 = vpop.eup %767 }
 0x108   : > { %v770_v41 = vpop.eup %769  ;;  %v515_v42 = vadd.f32 1.0, %v768_v40 }
 0x109   : > { %v516_v43 = vadd.f32 1.0, %v770_v41 }
 0x10a   : > { %v772_v45 = vpop.eup %771  ;;  %775 = vrcp.f32 %v515_v42  ;;  %v556_v55 = vand.u32 2147483647, %v515_v42  ;;  %v558_v59 = vand.u32 2147483648, %v515_v42  ;;  %vm552_vm0 = vweird.f32 %v515_v42 }
 0x10b   : > { %v774_v46 = vpop.eup %773  ;;  %777 = vrcp.f32 %v516_v43  ;;  %v513_v47 = vadd.f32 1.0, %v772_v45  ;;  %v571_v49 = vand.u32 2147483647, %v516_v43  ;;  %v573_v44 = vand.u32 2147483648, %v516_v43 }
 0x10c   : > { %v1027_v48 = vadd.f32 1.0, %v774_v46  ;;  %vm1030_vm1 = vcmp.eq.f32.partialorder %v556_v55, 8.507059e+37  ;;  %vm567_vm2 = vweird.f32 %v516_v43  ;;  %v559_v2 = vor.u32 1.1754944e-38, %v558_v59 }
 0x10d   : > { %779 = vrcp.f32 %v513_v47  ;;  %vm1034_vm5 = vcmp.eq.f32.partialorder %v571_v49, 8.507059e+37  ;;  %v574_v6 = vor.u32 1.1754944e-38, %v573_v44  ;;  %v526_v9 = vand.u32 2147483647, %v513_v47 }
 0x10e   : > { %781 = vrcp.f32 %v1027_v48  ;;  %v528_v54 = vand.u32 2147483648, %v513_v47  ;;  %v541_v12 = vand.u32 2147483647, %v1027_v48  ;;  %v543_v15 = vand.u32 2147483648, %v1027_v48 }
 0x10f   : > { %vm522_vm10 = vweird.f32 %v513_v47  ;;  %vm537_vm12 = vweird.f32 %v1027_v48  ;;  %vm527_vm13 = vcmp.eq.f32.partialorder %v526_v9, 8.507059e+37 }
 0x110   : > { %v776_v50 = vpop.eup %775  ;;  %v529_v21 = vor.u32 1.1754944e-38, %v528_v54  ;;  %v544_v35 = vor.u32 1.1754944e-38, %v543_v15  ;;  %vm542_vm15 = vcmp.eq.f32.partialorder %v541_v12, 8.507059e+37 }
 0x111   : > { %v778_v1 = vpop.eup %777  ;;  %v548_v58 = vmul.f32 %v776_v50, %v515_v42  ;;  %vm553_vm3 = vweird.f32 %v776_v50 }
 0x112   : > { %v563_v60 = vmul.f32 %v778_v1, %v516_v43  ;;  %vm568_vm4 = vweird.f32 %v778_v1  ;;  %vm554_vm6 = vmor %vm552_vm0, %vm553_vm3 }
 0x113   : > { %v549_v61 = vsub.f32 1.0, %v548_v58  ;;  %v780_v25 = vpop.eup %779  ;;  %vm569_vm7 = vmor %vm567_vm2, %vm568_vm4 }
 0x114   : > { %v564_v26 = vsub.f32 1.0, %v563_v60  ;;  %v782_v63 = vpop.eup %781  ;;  %v518_v22 = vmul.f32 %v780_v25, %v513_v47  ;;  %vm523_vm8 = vweird.f32 %v780_v25 }
 0x115   : > { %v550_v52 = vmul.f32 %v776_v50, %v549_v61  ;;  %v533_v51 = vmul.f32 %v782_v63, %v1027_v48  ;;  %vm538_vm9 = vweird.f32 %v782_v63  ;;  %vm524_vm11 = vmor %vm522_vm10, %vm523_vm8 }
 0x116   : > { %v565_v3 = vmul.f32 %v778_v1, %v564_v26  ;;  %v519_v7 = vsub.f32 1.0, %v518_v22  ;;  %vm539_vm14 = vmor %vm537_vm12, %vm538_vm9 }
 0x117   : > { %v551_v5 = vadd.f32 %v776_v50, %v550_v52  ;;  %v534_v11 = vsub.f32 1.0, %v533_v51 }
 0x118   : > { %v566_v10 = vadd.f32 %v778_v1, %v565_v3  ;;  %v520_v14 = vmul.f32 %v780_v25, %v519_v7 }
 0x119   : > { %v555_v13 = vsel %vm554_vm6, %v776_v50, %v551_v5  ;;  %v535_v17 = vmul.f32 %v782_v63, %v534_v11 }
 0x11a   : > { %v560_v0 = vsel %vm1030_vm1, %v559_v2, %v555_v13  ;;  %v570_v16 = vsel %vm569_vm7, %v778_v1, %v566_v10  ;;  %v521_v19 = vadd.f32 %v780_v25, %v520_v14 }
 0x11b   : > { %v575_v53 = vsel %vm1034_vm5, %v574_v6, %v570_v16  ;;  %v579_v18 = vmul.f32 %v560_v0, %v1015_v30  ;;  %v536_v23 = vadd.f32 %v782_v63, %v535_v17 }
 0x11c   : > { %v580_v20 = vmul.f32 %v575_v53, %v1017_v28  ;;  %v525_v57 = vsel %vm524_vm11, %v780_v25, %v521_v19 }
 0x11d   : > { %583 = vst [vmem:[%s190_s12 + $0x10] sm:$0xff] %v579_v18  ;;  %v530_v24 = vsel %vm527_vm13, %v529_v21, %v525_v57  ;;  %v540_v36 = vsel %vm539_vm14, %v782_v63, %v536_v23  ;;  %591 = sbr.rel (!%p873_p5) target bundleno = 298 (0x12a), region = 59 }
 0x11e   : > { %584 = vst [vmem:[%s190_s12 + $0x18] sm:$0xff] %v580_v20  ;;  %v545_v27 = vsel %vm542_vm15, %v544_v35, %v540_v36  ;;  %v577_v29 = vmul.f32 %v530_v24, %v1021_v37 }
 0x11f   : > { %v578_v30 = vmul.f32 %v545_v27, %v1023_v56 }
 0x120   : > { %581 = vst [vmem:[%s190_s12] sm:$0xff] %v577_v29 }
 0x121   : > { %582 = vst [vmem:[%s190_s12 + $0x8] sm:$0xff] %v578_v30 }
 0x124   : > { %v611_v32 = vld [vmem:[%s190_s12 + $0x10] sm:$0xff] }
 0x125   : > { %v613_v33 = vld [vmem:[%s190_s12 + $0x18] sm:$0xff]  ;;  %612 = vst [vmem:[%s594_s22 + $0x20] sm:$0xff] %v611_v32 }
 0x126   : > { %614 = vst [vmem:[%s594_s22 + $0x28] sm:$0xff] %v613_v33 }
 0x127   : > { %v607_v28 = vld [vmem:[%s190_s12] sm:$0xff] }
 0x128   : > { %v609_v31 = vld [vmem:[%s190_s12 + $0x8] sm:$0xff]  ;;  %608 = vst [vmem:[%s594_s22] sm:$0xff] %v607_v28 }
 0x129   : > { %610 = vst [vmem:[%s594_s22 + $0x8] sm:$0xff] %v609_v31 }
 0x12a PF: > { %p10_p10 = scmp.ge.s32.totalorder %s860_s16, 4   ;;  %s1079_s12 = smov %s801_s13 }
 0x12b   : > { %s1080_s13 = smov %s871_s19  ;;  %s1081_s14 = smov %s860_s16 }
 0x12c   :  { %12 = sbr.rel (!%p10_p10) target bundleno = 2 (0x2), region = 113 }

// kernel: csp_omnikernel_forward.7
= control target key start
LH: loop header
LB: loop body
LE: loop exit
PB: predicated region body
PF: predicated region fallthrough
CT: control target
= control target key end

     0   :  { %s359_s12 = smov 0   ;;  %s386_s0 = inlined_call_operand.vmem [shape: f32[4,512], index: 0, kind: input, shape index: {}]   ;;  %s387_s1 = inlined_call_operand.vmem [shape: f32[8,4], index: 1, kind: input, shape index: {}]   ;;  %s388_s2 = inlined_call_operand.vmem [shape: f32[8,1], index: 2, kind: input, shape index: {}]   ;;  %s389_s3 = inlined_call_operand.vmem [shape: f32[8,512], index: 3, kind: output, shape index: {}]  }
   0x1 LB: > { %s298_s13 = sadd.s32 4294967295, %s333_s12   ;;  %p302_p0 = scmp.ge.s32.totalorder %s333_s12, 1  ;;  %s333_s12 = sphi %s359_s12, %s13_s12  }
   0x2   : > { %p138_p1 = scmp.lt.s32.totalorder %s333_s12, 3 }
   0x4   : > { %p139_p2 = pnand %p302_p0, %p138_p1 }
   0x5   : > { %s303_s18 = sshll.u32 (!%p139_p2), %s298_s13, 1 }
   0x6   : > { %142 = sbr.rel (%p139_p2) target bundleno = 149 (0x95), region = 32  ;;  %p163_p3 = scmp.lt.s32.totalorder (!%p139_p2), %s303_s18, 3 }
   0xb   : > { %v174_v0 = vld [vmem:[%s387_s1] sm:$0xff]  ;;  %v335_v1 = vmov 0   ;;  %v336_v2 = vmov 2   ;;  %v337_v4 = vmov 1   ;;  %v338_v5 = vmov 3   ;;  %s391_s18 = smov (!%p163_p3, %s303_s18), 3 }
   0xc   : > { %321 = vset.pattern.permute.xlu0 %v335_v1  ;;  %323 = vset.pattern.permute.xlu1 %v336_v2  ;;  %v232_v3 = vld [vmem:[%s388_s2] sm:$0xff]  ;;  %s304_s19 = sshll.u32 %s391_s18, 2  ;;  %s306_s23 = sshll.u32 %s391_s18, 3 }
   0xd   : > { %178 = vperm.xlu0 %321, %v174_v0   ;;  %205 = vperm.xlu1 %323, %v174_v0   ;;  %s166_s22 = scalar_lea.vmem %s386_s0, %s304_s19  ;;  %s172_s26 = scalar_lea.vmem %s389_s3, %s306_s23 }
   0xe   : > { %325 = vset.pattern.permute.xlu2 %v335_v1  ;;  %v175_v6 = vld [vmem:[%s166_s22] sm:$0xff] }
   0xf   : > { %235 = vperm.xlu2 %325, %v232_v3   ;;  %v182_v9 = vperm.slane %v175_v6, 0  ;;  %v183_v10 = vperm.slane %v175_v6, 4  ;;  %v194_v11 = vperm.slane %v175_v6, 1  ;;  %v195_v12 = vperm.slane %v175_v6, 5 }
  0x10   : > { %v208_v13 = vperm.slane %v175_v6, 2  ;;  %v209_v14 = vperm.slane %v175_v6, 6  ;;  %v222_v15 = vperm.slane %v175_v6, 3  ;;  %v223_v16 = vperm.slane %v175_v6, 7 }
  0x11   : > { %v186_v17 = vperm.slane %v182_v9, 0  ;;  %v187_v18 = vperm.slane %v183_v10, 0  ;;  %v198_v19 = vperm.slane %v194_v11, 1  ;;  %v199_v20 = vperm.slane %v195_v12, 1 }
  0x12   : > { %v212_v21 = vperm.slane %v208_v13, 2  ;;  %v213_v22 = vperm.slane %v209_v14, 2  ;;  %v226_v23 = vperm.slane %v222_v15, 3  ;;  %v227_v24 = vperm.slane %v223_v16, 3 }
  0x15   : > { %322 = vset.pattern.permute.xlu0 %v337_v4  ;;  %324 = vset.pattern.permute.xlu1 %v338_v5 }
  0x16   : > { %191 = vperm.xlu0 %322, %v174_v0   ;;  %219 = vperm.xlu1 %324, %v174_v0  }
  0x1e   : > { %326 = vset.pattern.permute.xlu0 %v335_v1 }
  0x69   : > { %v236_v39 = vpop.permute.xlu2 %235 }
  0x7f   : > { %v179_v7 = vpop.permute.xlu0 %178  ;;  %v206_v8 = vpop.permute.xlu1 %205 }
  0x80   : > { %v188_v27 = vmul.f32 %v186_v17, %v179_v7  ;;  %v189_v28 = vmul.f32 %v187_v18, %v179_v7  ;;  %v214_v31 = vmul.f32 %v212_v21, %v206_v8  ;;  %v215_v32 = vmul.f32 %v213_v22, %v206_v8 }
  0x88   : > { %v192_v25 = vpop.permute.xlu0 %191  ;;  %v220_v26 = vpop.permute.xlu1 %219 }
  0x89   : > { %v200_v29 = vmul.f32 %v198_v19, %v192_v25  ;;  %v201_v30 = vmul.f32 %v199_v20, %v192_v25  ;;  %v228_v35 = vmul.f32 %v226_v23, %v220_v26  ;;  %v229_v36 = vmul.f32 %v227_v24, %v220_v26 }
  0x8b   : > { %v202_v33 = vadd.f32 %v200_v29, %v188_v27  ;;  %v203_v34 = vadd.f32 %v201_v30, %v189_v28 }
  0x8d   : > { %v216_v37 = vadd.f32 %v214_v31, %v202_v33  ;;  %v217_v38 = vadd.f32 %v215_v32, %v203_v34 }
  0x8f   : > { %v230_v40 = vadd.f32 %v228_v35, %v216_v37  ;;  %v231_v41 = vadd.f32 %v229_v36, %v217_v38 }
  0x91   : > { %v238_v42 = vadd.f32 %v236_v39, %v230_v40  ;;  %v239_v43 = vadd.f32 %v236_v39, %v231_v41 }
  0x93   : > { %240 = vst [vmem:[%s172_s26] sm:$0xff] %v238_v42 }
  0x94   : > { %241 = vst [vmem:[%s172_s26 + $0x8] sm:$0xff] %v239_v43 }
  0x95 PF: > { %s13_s12 = sadd.s32 1, %s333_s12  }
  0x96   : > { %p10_p4 = scmp.ge.s32.totalorder %s13_s12, 4  }
  0x98   :  { %12 = sbr.rel (!%p10_p4) target bundleno = 1 (0x1), region = 62 }

// kernel: csp_omnikernel_forward.8
= control target key start
LH: loop header
LB: loop body
LE: loop exit
PB: predicated region body
PF: predicated region fallthrough
CT: control target
= control target key end

     0   :  { %s961_s25 = smov 0   ;;  %s1026_s0 = inlined_call_operand.vmem [shape: f32[4,512], index: 0, kind: input, shape index: {}]   ;;  %s1027_s1 = inlined_call_operand.vmem [shape: f32[4,512], index: 1, kind: input, shape index: {}]   ;;  %s1028_s2 = inlined_call_operand.vmem [shape: f32[4,512], index: 2, kind: input, shape index: {}]   ;;  %s1029_s3 = inlined_call_operand.vmem [shape: f32[4,512], index: 3, kind: input, shape index: {}]   ;;  %s1030_s4 = inlined_call_operand.vmem [shape: f32[4,512], index: 4, kind: input, shape index: {}]   ;;  %s1031_s5 = inlined_call_operand.vmem [shape: f32[4,512], index: 5, kind: input, shape index: {}]   ;;  %s1032_s6 = inlined_call_operand.vmem [shape: f32[4,512], index: 6, kind: input, shape index: {}]   ;;  %s1033_s7 = inlined_call_operand.vmem [shape: f32[4,1], index: 7, kind: input, shape index: {}]   ;;  %s1034_s8 = inlined_call_operand.vmem [shape: f32[4,1], index: 8, kind: input, shape index: {}]   ;;  %s1035_s9 = inlined_call_operand.vmem [shape: f32[4,1], index: 9, kind: input, shape index: {}]   ;;  %s1036_s10 = inlined_call_operand.vmem [shape: f32[4,1], index: 10, kind: input, shape index: {}]   ;;  %s1037_s11 = inlined_call_operand.vmem [shape: f32[4,4], index: 11, kind: input, shape index: {}]   ;;  %s1038_s12 = inlined_call_operand.vmem [shape: f32[4,1], index: 12, kind: input, shape index: {}]   ;;  %s1039_s13 = inlined_call_operand.vmem [shape: f32[4,512], index: 13, kind: output, shape index: {}]  }
   0x1 LB: > { %s834_s26 = sadd.s32 4294967295, %s884_s25   ;;  %p838_p0 = scmp.ge.s32.totalorder %s884_s25, 1  ;;  %s884_s25 = sphi %s961_s25, %s23_s25  }
   0x2   : > { %p454_p1 = scmp.lt.s32.totalorder %s884_s25, 3 }
   0x4   : > { %p455_p2 = pnand %p838_p0, %p454_p1 }
   0x5   : > { %s839_s22 = sshll.u32 (!%p455_p2), %s834_s26, 1 }
   0x6   : > { %458 = sbr.rel (%p455_p2) target bundleno = 164 (0xa4), region = 72  ;;  %p529_p3 = scmp.lt.s32.totalorder (!%p455_p2), %s839_s22, 3 }
   0xb   : > { %v608_v0 = vld [vmem:[%s1035_s9] sm:$0xf]  ;;  %v886_v2 = vmov 0   ;;  %v887_v6 = vmov 1   ;;  %v888_v7 = vmov 3   ;;  %v889_v8 = vmov 2  }
   0xc   : > { %v584_v1 = vld [vmem:[%s1033_s7] sm:$0xf]  ;;  %871 = vset.pattern.permute.xlu1 %v886_v2  ;;  %870 = vset.pattern.permute.xlu0 %v886_v2  ;;  %s1041_s22 = smov (!%p529_p3, %s839_s22), 3  ;;  %v890_v10 = vmov 839922192   ;;  %vm702_vm0 = vcmask 1043456  }
   0xd   : > { %611 = vperm.xlu1 %871, %v608_v0   ;;  %587 = vperm.xlu0 %870, %v584_v1   ;;  %v634_v3 = vld [vmem:[%s1037_s11] sm:$0xf]  ;;  %s989_s23 = sshll.u32 %s1041_s22, 2  ;;  %v590_v11 = vunpack.c.l.s4 %v890_v10 }
   0xe   : > { %872 = vset.pattern.permute.xlu2 %v886_v2  ;;  %v621_v4 = vld [vmem:[%s1036_s10] sm:$0xf]  ;;  %s532_s28 = scalar_lea.vmem %s1026_s0, %s989_s23  ;;  %s544_s14 = scalar_lea.vmem %s1028_s2, %s989_s23 }
   0xf   : > { %637 = vperm.xlu2 %872, %v634_v3   ;;  %v596_v5 = vld [vmem:[%s1034_s8] sm:$0xf]  ;;  %s550_s16 = scalar_lea.vmem %s1029_s3, %s989_s23  ;;  %v591_v14 = vunpack.c.0.s8 %v590_v11  ;;  %s538_s19 = scalar_lea.vmem %s1027_s1, %s989_s23 }
  0x10   : > { %v691_v9 = vld [vmem:[%s1038_s12] sm:$0xf]  ;;  %s556_s22 = scalar_lea.vmem %s1030_s4, %s989_s23 }
  0x11   : > { %v576_v12 = vld [vmem:[%s532_s28] sm:$0xff]  ;;  %s562_s28 = scalar_lea.vmem %s1031_s5, %s989_s23 }
  0x12   : > { %v577_v13 = vld [vmem:[%s544_s14] sm:$0xff]  ;;  %s568_s14 = scalar_lea.vmem %s1032_s6, %s989_s23 }
  0x13   : > { %v578_v15 = vadd.f32 %v577_v13, %v576_v12  ;;  %v579_v16 = vld [vmem:[%s550_s16] sm:$0xff]  ;;  %s574_s16 = scalar_lea.vmem %s1039_s13, %s989_s23 }
  0x14   : > { %v583_v21 = vld [vmem:[%s538_s19] sm:$0xff] }
  0x15   : > { %624 = vperm.xlu1 %871, %v621_v4   ;;  %599 = vperm.xlu0 %870, %v596_v5   ;;  %v580_v20 = vadd.f32 %v579_v16, %v578_v15  ;;  %v581_v22 = vld [vmem:[%s556_s22] sm:$0xff] }
  0x16   : > { %v607_v27 = vld [vmem:[%s562_s28] sm:$0xff] }
  0x17   : > { %873 = vset.pattern.permute.xlu2 %v887_v6  ;;  %v582_v24 = vadd.f32 %v581_v22, %v580_v20  ;;  %v620_v33 = vld [vmem:[%s568_s14] sm:$0xff] }
  0x18   : > { %650 = vperm.xlu2 %873, %v634_v3  }
  0x1d   : > { %875 = vset.pattern.permute.xlu1 %v888_v7  ;;  %874 = vset.pattern.permute.xlu0 %v889_v8 }
  0x1e   : > { %678 = vperm.xlu1 %875, %v634_v3   ;;  %664 = vperm.xlu0 %874, %v634_v3  }
  0x20   : > { %876 = vset.pattern.permute.xlu2 %v886_v2 }
  0x21   : > { %694 = vperm.xlu2 %876, %v691_v9  }
  0x26   : > { %877 = vset.pattern.permute.xlu0 %v886_v2 }
  0x69   : > { %v638_v26 = vpop.permute.xlu2 %637 }
  0x72   : > { %v651_v40 = vpop.permute.xlu2 %650 }
  0x7b   : > { %v695_v7 = vpop.permute.xlu2 %694 }
  0x7f   : > { %v612_v17 = vpop.permute.xlu1 %611  ;;  %v588_v18 = vpop.permute.xlu0 %587 }
  0x80   : > { %v592_v19 = vperm.slane %v588_v18, %v591_v14  ;;  %v616_v25 = vperm.slane %v612_v17, %v591_v14 }
  0x82   : > { %v594_v23 = vmul.f32 %v592_v19, %v583_v21  ;;  %v618_v34 = vmul.f32 %v616_v25, %v607_v27 }
  0x84   : > { %v595_v31 = vadd.f32 %v594_v23, %v582_v24 }
  0x87   : > { %v625_v28 = vpop.permute.xlu1 %624  ;;  %v600_v29 = vpop.permute.xlu0 %599 }
  0x88   : > { %v629_v30 = vperm.slane %v625_v28, %v591_v14  ;;  %v604_v32 = vperm.slane %v600_v29, %v591_v14 }
  0x8a   : > { %v606_v35 = vadd.f32 %v604_v32, %v595_v31  ;;  %v631_v36 = vmul.f32 %v629_v30, %v620_v33 }
  0x8c   : > { %v619_v37 = vadd.f32 %v618_v34, %v606_v35 }
  0x8e   : > { %v632_v38 = vadd.f32 %v631_v36, %v619_v37 }
  0x90   : > { %v633_v39 = vmax.f32 %v632_v38, 0.0  ;;  %v665_v55 = vpop.permute.xlu0 %664  ;;  %v679_v62 = vpop.permute.xlu1 %678 }
  0x92   : > { %v641_v41 = vperm.slane %v633_v39, 0  ;;  %v642_v42 = vperm.slane %v633_v39, 4  ;;  %v653_v43 = vperm.slane %v633_v39, 1  ;;  %v654_v44 = vperm.slane %v633_v39, 5 }
  0x93   : > { %v681_v45 = vperm.slane %v633_v39, 3  ;;  %v682_v46 = vperm.slane %v633_v39, 7  ;;  %v667_v47 = vperm.slane %v633_v39, 2  ;;  %v668_v48 = vperm.slane %v633_v39, 6 }
  0x94   : > { %v645_v49 = vperm.slane %v641_v41, 0  ;;  %v646_v50 = vperm.slane %v642_v42, 0  ;;  %v657_v51 = vperm.slane %v653_v43, 1  ;;  %v658_v52 = vperm.slane %v654_v44, 1 }
  0x95   : > { %v685_v53 = vperm.slane %v681_v45, 3  ;;  %v686_v54 = vperm.slane %v682_v46, 3  ;;  %v671_v56 = vperm.slane %v667_v47, 2  ;;  %v672_v57 = vperm.slane %v668_v48, 2 }
  0x96   : > { %v647_v58 = vmul.f32 %v645_v49, %v638_v26  ;;  %v648_v59 = vmul.f32 %v646_v50, %v638_v26  ;;  %v659_v60 = vmul.f32 %v657_v51, %v651_v40  ;;  %v660_v61 = vmul.f32 %v658_v52, %v651_v40 }
  0x97   : > { %v673_v1 = vmul.f32 %v671_v56, %v665_v55  ;;  %v674_v2 = vmul.f32 %v672_v57, %v665_v55  ;;  %v687_v3 = vmul.f32 %v685_v53, %v679_v62  ;;  %v688_v4 = vmul.f32 %v686_v54, %v679_v62 }
  0x98   : > { %v661_v63 = vadd.f32 %v659_v60, %v647_v58  ;;  %v662_v0 = vadd.f32 %v660_v61, %v648_v59 }
  0x9a   : > { %v675_v5 = vadd.f32 %v673_v1, %v661_v63  ;;  %v676_v6 = vadd.f32 %v674_v2, %v662_v0 }
  0x9c   : > { %v689_v8 = vadd.f32 %v687_v3, %v675_v5  ;;  %v690_v9 = vadd.f32 %v688_v4, %v676_v6 }
  0x9e   : > { %v698_v10 = vadd.f32 %v695_v7, %v690_v9  ;;  %v697_v11 = vadd.f32 %v695_v7, %v689_v8 }
  0xa0   : > { %v701_v12 = vrot.slane %v698_v10, 4 }
  0xa2   : > { %v703_v13 = vsel %vm702_vm0, %v697_v11, %v701_v12 }
  0xa3   : > { %705 = vst [vmem:[%s574_s16] sm:$0xff] %v703_v13 }
  0xa4 PF: > { %s23_s25 = sadd.s32 1, %s884_s25  }
  0xa5   : > { %p20_p4 = scmp.ge.s32.totalorder %s23_s25, 4  }
  0xa7   :  { %22 = sbr.rel (!%p20_p4) target bundleno = 1 (0x1), region = 120 }

</bundles_post_ra>
